<compile_context>
chip_gen: v7x
topology: tpu7x:2x2x1
jax: 0.10.0
libtpu: 0.0.40
codegen_flags: <defaults>
</compile_context>

<pallas_src>
import functools

import jax
import jax.numpy as jnp
import numpy as np
from jax.experimental import pallas as pl
from jax.experimental.pallas import tpu as pltpu

POOL = 64
FEAT = POOL * POOL * 3  # 12288


# ---------------------------------------------------------------------------
# Kernel 1: gamma MLP, K-blocked over the 12288-wide first layer.
#   (B, FEAT) @ (FEAT,128) -> +b1, ReLU -> (128,32) -> +b2, ReLU
#   -> (32,1) -> +b3 -> 2*sigmoid
# ---------------------------------------------------------------------------
def _mlp_kernel(x_ref, w1_ref, b1_ref, w2_ref, b2_ref, w3_ref, b3_ref,
                o_ref, acc_ref):
    k = pl.program_id(0)

    @pl.when(k == 0)
    def _():
        acc_ref[...] = jnp.zeros_like(acc_ref)

    # Partial first-layer matmul for this K slab.  x is resident in VMEM
    # (constant index map); the bf16 w1 slab is the only big HBM stream.
    xs = x_ref[k]                                    # (B, tk)
    acc_ref[...] += jnp.dot(xs.astype(jnp.bfloat16), w1_ref[...],
                            preferred_element_type=jnp.float32)

    @pl.when(k == pl.num_programs(0) - 1)
    def _():
        h = jnp.maximum(acc_ref[...] + b1_ref[...], 0.0)
        h = jnp.dot(h, w2_ref[...], preferred_element_type=jnp.float32)
        h = jnp.maximum(h + b2_ref[...], 0.0)
        h = jnp.dot(h, w3_ref[...], preferred_element_type=jnp.float32)
        o_ref[...] = 2.0 * jax.nn.sigmoid(h + b3_ref[...])


def gamma_mlp(flat, params, tk=6144):
    """flat: (B, FEAT) f32 -> (B, 1) f32 gamma in (0, 2)."""
    w1, b1, w2, b2, w3, b3 = params
    B, K = flat.shape
    h1 = w1.shape[1]
    if tk >= K or K % tk != 0:
        tk = K                                        # single fully-resident slab
    nk = K // tk

    # Activations fully resident: one (nk, B, tk) block (~B * 48 KB), no
    # per-step activation DMAs.  Pure reshape + tiny transpose host-side.
    xr = flat.reshape(B, nk, tk).transpose(1, 0, 2)

    # bf16 w1 halves the dominant HBM stream; MXU takes bf16 natively and the
    # accumulator stays f32.  TODO(synk): store w1 as bf16 at init to avoid
    # the per-call cast when not under jit.
    w1b = w1.astype(jnp.bfloat16)

    def const(arr):
        # Constant index map across the K axis -> fetched once, kept resident.
        return pl.BlockSpec(arr.shape, lambda k, _nd=arr.ndim: (0,) * _nd)

    return pl.pallas_call(
        _mlp_kernel,
        out_shape=jax.ShapeDtypeStruct((B, 1), jnp.float32),
        grid=(nk,),
        in_specs=[const(xr),                               # activations, resident
                  pl.BlockSpec((tk, h1), lambda k: (k, 0)),  # bf16 w1 slab (streamed)
                  const(b1), const(w2), const(b2), const(w3), const(b3)],
        out_specs=pl.BlockSpec((B, 1), lambda k: (0, 0)),
        scratch_shapes=[pltpu.VMEM((B, h1), jnp.float32)],
        compiler_params=pltpu.CompilerParams(
            dimension_semantics=("arbitrary",)),
    )(xr, w1b, b1, w2, b2, w3, b3)


# ---------------------------------------------------------------------------
# Kernel 2: Taylor expansion (Horner form, scalar coefficients from SMEM)
#           + per-(b, c) mean / unbiased-std normalization.
# ---------------------------------------------------------------------------
def _taylor_norm_kernel(g_ref, x_ref, o_ref, *, apply_norm):
    # gamma for this batch element, read once from SMEM as a scalar.
    g = g_ref[pl.program_id(0)]
    c1 = g
    c2 = g * (g - 1.0) * 0.5
    c3 = g * (g - 1.0) * (g - 2.0) * (1.0 / 6.0)

    d = x_ref[...] - 1.0                              # (1, 1, H, W)
    # Horner for (out - 1): d*(c1 + d*(c2 + d*c3))
    om1 = d * (c1 + d * (c2 + d * c3))

    if apply_norm:
        n = om1.shape[-2] * om1.shape[-1]
        # Shifted moments about 1: no catastrophic cancellation when out ~ 1.
        s = jnp.sum(om1, axis=(-2, -1), keepdims=True)
        ss = jnp.sum(om1 * om1, axis=(-2, -1), keepdims=True)
        # torch .std() default is unbiased (ddof=1).  No epsilon, to match
        # torch: a constant-valued plane yields NaN there too.
        var = (ss - s * s * (1.0 / n)) * (1.0 / (n - 1))
        o_ref[...] = (om1 - s * (1.0 / n)) * jax.lax.rsqrt(var)
    else:
        o_ref[...] = om1 + 1.0


def _taylor_stats_kernel(g_ref, x_ref, s_ref, ss_ref):
    # Pass 1 of the split-W path: accumulate per-(b, c) sum / sum-of-squares
    # of (out - 1) in tiny resident output blocks (pl.when init/accumulate).
    b = pl.program_id(0)
    w = pl.program_id(2)

    @pl.when(w == 0)
    def _():
        s_ref[...] = jnp.zeros_like(s_ref)
        ss_ref[...] = jnp.zeros_like(ss_ref)

    g = g_ref[b]
    c1 = g
    c2 = g * (g - 1.0) * 0.5
    c3 = g * (g - 1.0) * (g - 2.0) * (1.0 / 6.0)
    d = x_ref[...] - 1.0
    om1 = d * (c1 + d * (c2 + d * c3))
    s_ref[...] += jnp.sum(om1, axis=(-2, -1), keepdims=True)
    ss_ref[...] += jnp.sum(om1 * om1, axis=(-2, -1), keepdims=True)


def _taylor_apply_kernel(g_ref, mean_ref, istd_ref, x_ref, o_ref):
    # Pass 2 of the split-W path: recompute Horner (cheap VALU) and apply
    # (out - mean) * rsqrt(var) with per-(b, c) scalars from SMEM.
    b = pl.program_id(0)
    c = pl.program_id(1)
    g = g_ref[b]
    c1 = g
    c2 = g * (g - 1.0) * 0.5
    c3 = g * (g - 1.0) * (g - 2.0) * (1.0 / 6.0)
    d = x_ref[...] - 1.0
    om1 = d * (c1 + d * (c2 + d * c3))                # out - 1
    # mean_ref holds mean(out - 1); (out - mean_out) == (om1 - mean(om1)).
    o_ref[...] = (om1 - mean_ref[b, c]) * istd_ref[b, c]


def _default_vmem_budget():
    """Generation-aware VMEM budget for block selection (bytes)."""
    cap = None
    try:
        info = pltpu.get_tpu_info()
        cap = getattr(info, "vmem_capacity_bytes", None)
    except Exception:
        cap = None
    if not cap:
        cap = 64 << 20        # conservative fallback (v7x physical VMEM)
    return max(24 << 20, int(cap * 0.55))


def _pick_tile_w(W, H, budget_bytes):
    """Largest tw (multiple of 128, divides W) with 4 * H * tw * 4 <= budget."""
    cap = budget_bytes // (16 * H)
    best = 0
    t = 128
    while t <= W:
        if W % t == 0 and t <= cap:
            best = t
        t += 128
    return best


def taylor_normalize(x, gamma, apply_norm=True, vmem_budget=None):
    B, C, H, W = x.shape
    g = gamma.reshape(B).astype(jnp.float32)
    budget = _default_vmem_budget() if vmem_budget is None else int(vmem_budget)
    # Grant the scoped VMEM we plan to use (default scope is only 16/32 MiB).
    vmem_limit = int(max(budget, 32 << 20))

    smem_spec = pl.BlockSpec(memory_space=pltpu.MemorySpace.SMEM)
    plane_bytes = H * W * 4

    # ---- Fit path: one (b, c) plane per step (in + out, double-buffered). ---
    if 4 * plane_bytes <= int(budget * 0.9):
        kernel = functools.partial(_taylor_norm_kernel, apply_norm=apply_norm)
        return pl.pallas_call(
            kernel,
            out_shape=jax.ShapeDtypeStruct((B, C, H, W), jnp.float32),
            grid=(B, C),
            in_specs=[smem_spec,                                   # gamma (B,)
                      pl.BlockSpec((1, 1, H, W), lambda b, c: (b, c, 0, 0))],
            out_specs=pl.BlockSpec((1, 1, H, W), lambda b, c: (b, c, 0, 0)),
            compiler_params=pltpu.CompilerParams(
                dimension_semantics=("parallel", "parallel"),
                vmem_limit_bytes=vmem_limit),
        )(g, x)

    # ---- Split-W streaming path (large planes, e.g. 2048x2048 on v7x). -----
    tw = _pick_tile_w(W, H, int(budget * 0.9))
    assert tw > 0, (
        "W must be a multiple of 128 and a (H x 128) column must fit VMEM for "
        "the split-W streaming path")
    # TODO(synk): add a split-H level for planes where even one 128-wide column
    # exceeds VMEM (H > ~15k rows).
    nw = W // tw

    if not apply_norm:
        kernel = functools.partial(_taylor_norm_kernel, apply_norm=False)
        return pl.pallas_call(
            kernel,
            out_shape=jax.ShapeDtypeStruct((B, C, H, W), jnp.float32),
            grid=(B, C, nw),
            in_specs=[smem_spec,
                      pl.BlockSpec((1, 1, H, tw), lambda b, c, w: (b, c, 0, w))],
            out_specs=pl.BlockSpec((1, 1, H, tw), lambda b, c, w: (b, c, 0, w)),
            compiler_params=pltpu.CompilerParams(
                dimension_semantics=("parallel", "parallel", "parallel"),
                vmem_limit_bytes=vmem_limit),
        )(g, x)

    # Pass 1: per-(b, c) shifted sums, accumulated across the W axis.
    s, ss = pl.pallas_call(
        _taylor_stats_kernel,
        out_shape=(jax.ShapeDtypeStruct((B, C, 1, 1), jnp.float32),
                   jax.ShapeDtypeStruct((B, C, 1, 1), jnp.float32)),
        grid=(B, C, nw),
        in_specs=[smem_spec,
                  pl.BlockSpec((1, 1, H, tw), lambda b, c, w: (b, c, 0, w))],
        out_specs=(pl.BlockSpec((1, 1, 1, 1), lambda b, c, w: (b, c, 0, 0)),
                   pl.BlockSpec((1, 1, 1, 1), lambda b, c, w: (b, c, 0, 0))),
        compiler_params=pltpu.CompilerParams(
            dimension_semantics=("parallel", "parallel", "arbitrary"),
            vmem_limit_bytes=vmem_limit),
    )(g, x)

    # Tiny glue in plain JAX: per-(b, c) mean(out-1) and rsqrt(var).
    n = float(H * W)
    s2 = s.reshape(B, C)
    ss2 = ss.reshape(B, C)
    mean_om1 = s2 / n
    var = (ss2 - s2 * s2 / n) / (n - 1.0)
    istd = jax.lax.rsqrt(var)

    # Pass 2: recompute Horner and apply normalization tile by tile.
    return pl.pallas_call(
        _taylor_apply_kernel,
        out_shape=jax.ShapeDtypeStruct((B, C, H, W), jnp.float32),
        grid=(B, C, nw),
        in_specs=[smem_spec,                                   # gamma (B,)
                  smem_spec,                                   # mean_om1 (B, C)
                  smem_spec,                                   # istd (B, C)
                  pl.BlockSpec((1, 1, H, tw), lambda b, c, w: (b, c, 0, w))],
        out_specs=pl.BlockSpec((1, 1, H, tw), lambda b, c, w: (b, c, 0, w)),
        compiler_params=pltpu.CompilerParams(
            dimension_semantics=("parallel", "parallel", "parallel"),
            vmem_limit_bytes=vmem_limit),
    )(g, mean_om1, istd, x)


# ---------------------------------------------------------------------------
# Full forward (glue: adaptive avg pool + flatten, then the two kernels)
# ---------------------------------------------------------------------------
def gamma_change_forward(x, params, apply_norm=True, vmem_budget=None):
    B, C, H, W = x.shape
    assert C == 3 and H % POOL == 0 and W % POOL == 0
    # AdaptiveAvgPool2d(64): exact block-average when H, W are multiples of 64.
    pooled = x.reshape(B, C, POOL, H // POOL, POOL, W // POOL).mean(axis=(3, 5))
    flat = pooled.reshape(B, -1)                  # (B, 64*64*3), row-major like torch .view
    gamma = gamma_mlp(flat, params)               # (B, 1)
    return taylor_normalize(x, gamma, apply_norm, vmem_budget=vmem_budget)


# ---------------------------------------------------------------------------
# Deterministic parameter init (PyTorch Linear-style uniform bounds)
# ---------------------------------------------------------------------------
def init_params(key):
    dims = [(FEAT, 128), (128, 32), (32, 1)]
    params = []
    for fi, fo in dims:
        key, kw, kb = jax.random.split(key, 3)
        bound = 1.0 / np.sqrt(fi)
        params.append(jax.random.uniform(kw, (fi, fo), jnp.float32, -bound, bound))
        params.append(jax.random.uniform(kb, (1, fo), jnp.float32, -bound, bound))
    return tuple(params)


# ---------------------------------------------------------------------------
# Pure-JAX reference (mirrors the PyTorch forward exactly, f32 weights)
# ---------------------------------------------------------------------------
def reference_forward(x, params, apply_norm=True):
    w1, b1, w2, b2, w3, b3 = params
    B, C, H, W = x.shape
    pooled = x.reshape(B, C, POOL, H // POOL, POOL, W // POOL).mean(axis=(3, 5))
    flat = pooled.reshape(B, -1)
    h = jnp.maximum(flat @ w1 + b1, 0.0)
    h = jnp.maximum(h @ w2 + b2, 0.0)
    g = 2.0 * jax.nn.sigmoid(h @ w3 + b3)         # (B, 1)
    g = g[:, :, None, None]
    d = x - 1.0
    out = (1.0 + g * d + g * (g - 1.0) * d ** 2 / 2.0
           + g * (g - 1.0) * (g - 2.0) * d ** 3 / 6.0)
    if not apply_norm:
        return out
    flat_out = out.reshape(B, C, -1)
    mean = flat_out.mean(-1)[:, :, None, None]
    std = flat_out.std(-1, ddof=1)[:, :, None, None]
    return (out - mean) / std


if __name__ == "__main__":
    key = jax.random.PRNGKey(0)
    kx, kp, kx2 = jax.random.split(key, 3)

    B, C, H, W = 2, 3, 128, 128
    x = jax.random.uniform(kx, (B, C, H, W), jnp.float32)
    params = init_params(kp)

    # Fit path (per-plane blocks), normalization on.  Tolerance covers the
    # bf16 w1 stream (gamma goes through a sigmoid -> tiny deviation).
    out = jax.block_until_ready(gamma_change_forward(x, params, apply_norm=True))
    ref = jax.block_until_ready(reference_forward(x, params, apply_norm=True))
    np.testing.assert_allclose(np.asarray(out), np.asarray(ref), rtol=2e-3, atol=2e-3)
    assert out.shape == (B, C, H, W) and out.dtype == jnp.float32

    # apply_norm=False path.
    out2 = jax.block_until_ready(gamma_change_forward(x, params, apply_norm=False))
    ref2 = jax.block_until_ready(reference_forward(x, params, apply_norm=False))
    np.testing.assert_allclose(np.asarray(out2), np.asarray(ref2), rtol=2e-3, atol=2e-3)

    # Split-W streaming-stats fallback, forced with a tiny VMEM budget
    # (exercises the two-pass path that big planes take on v7x).
    x3 = jax.random.uniform(kx2, (1, 3, 128, 256), jnp.float32)
    out3 = jax.block_until_ready(
        gamma_change_forward(x3, params, apply_norm=True, vmem_budget=300 << 10))
    ref3 = jax.block_until_ready(reference_forward(x3, params, apply_norm=True))
    np.testing.assert_allclose(np.asarray(out3), np.asarray(ref3), rtol=2e-3, atol=2e-3)

    print("KERNEL_OK")
</pallas_src>

<mosaic_0001>
module attributes {stable_mosaic.version = 11 : i64} {
  func.func @_mlp_kernel(%arg0: i32, %arg1: memref<2x2x6144xf32, #tpu.memory_space<vmem>>, %arg2: memref<6144x128xbf16, #tpu.memory_space<vmem>>, %arg3: memref<1x128xf32, #tpu.memory_space<vmem>>, %arg4: memref<128x32xf32, #tpu.memory_space<vmem>>, %arg5: memref<1x32xf32, #tpu.memory_space<vmem>>, %arg6: memref<32x1xf32, #tpu.memory_space<vmem>>, %arg7: memref<1x1xf32, #tpu.memory_space<vmem>>, %arg8: memref<2x1xf32, #tpu.memory_space<vmem>>, %arg9: memref<2x128xf32, #tpu.memory_space<vmem>>) attributes {dimension_semantics = [#tpu.dimension_semantics<arbitrary>], iteration_bounds = array<i64: 2>, scalar_prefetch = 0 : i64, scratch_operands = 1 : i64, tpu.core_type = #tpu.core_type<tc>, window_params = [{pipeline_mode = #tpu.pipeline_mode<synchronous>, transform_indices = @transform_0, window_bounds = array<i64: 2, 2, 6144>}, {transform_indices = @transform_1, window_bounds = array<i64: 6144, 128>}, {pipeline_mode = #tpu.pipeline_mode<synchronous>, transform_indices = @transform_2, window_bounds = array<i64: 1, 128>}, {pipeline_mode = #tpu.pipeline_mode<synchronous>, transform_indices = @transform_3, window_bounds = array<i64: 128, 32>}, {pipeline_mode = #tpu.pipeline_mode<synchronous>, transform_indices = @transform_4, window_bounds = array<i64: 1, 32>}, {pipeline_mode = #tpu.pipeline_mode<synchronous>, transform_indices = @transform_5, window_bounds = array<i64: 32, 1>}, {pipeline_mode = #tpu.pipeline_mode<synchronous>, transform_indices = @transform_6, window_bounds = array<i64: 1, 1>}, {pipeline_mode = #tpu.pipeline_mode<synchronous>, transform_indices = @transform_7, window_bounds = array<i64: 2, 1>}]} {
    %c0_i32 = arith.constant 0 : i32
    %0 = arith.cmpi eq, %arg0, %c0_i32 : i32
    %1 = arith.extui %0 : i1 to i32
    %c0_i32_0 = arith.constant 0 : i32
    %2 = arith.cmpi ne, %1, %c0_i32_0 : i32
    scf.if %2 {
      %cst_9 = arith.constant 0.000000e+00 : f32
      %15 = vector.broadcast %cst_9 : f32 to vector<2x128xf32>
      %c0_10 = arith.constant 0 : index
      %c0_11 = arith.constant 0 : index
      %16 = vector.load %arg9[%c0_10, %c0_11] : memref<2x128xf32, #tpu.memory_space<vmem>>, vector<2x128xf32>
      tpu.vector_store %arg9[%c0_10, %c0_11], %15 {strides = array<i32>} : memref<2x128xf32, #tpu.memory_space<vmem>>, vector<2x128xf32>,
    } else {
    }
    %3 = arith.index_cast %arg0 : i32 to index
    %c0 = arith.constant 0 : index
    %c0_1 = arith.constant 0 : index
    %4 = vector.load %arg1[%3, %c0, %c0_1] : memref<2x2x6144xf32, #tpu.memory_space<vmem>>, vector<1x2x6144xf32>
    %5 = vector.shape_cast %4 : vector<1x2x6144xf32> to vector<2x6144xf32>
    %c0_2 = arith.constant 0 : index
    %c0_3 = arith.constant 0 : index
    %6 = vector.load %arg9[%c0_2, %c0_3] : memref<2x128xf32, #tpu.memory_space<vmem>>, vector<2x128xf32>
    %7 = arith.truncf %5 : vector<2x6144xf32> to vector<2x6144xbf16>
    %c0_4 = arith.constant 0 : index
    %c0_5 = arith.constant 0 : index
    %8 = vector.load %arg2[%c0_4, %c0_5] : memref<6144x128xbf16, #tpu.memory_space<vmem>>, vector<6144x128xbf16>
    %cst = arith.constant dense<0.000000e+00> : vector<2x128xf32>
    %9 = tpu.matmul %7, %8, %cst {dimension_numbers = #tpu.dot_dimension_numbers<[1], [0], [0], [1], [0, 0, 1, 1], [], []>} : vector<2x6144xbf16>, vector<6144x128xbf16>, vector<2x128xf32> -> vector<2x128xf32>
    %10 = arith.addf %6, %9 : vector<2x128xf32>
    %c0_6 = arith.constant 0 : index
    %c0_7 = arith.constant 0 : index
    %11 = vector.load %arg9[%c0_6, %c0_7] : memref<2x128xf32, #tpu.memory_space<vmem>>, vector<2x128xf32>
    tpu.vector_store %arg9[%c0_6, %c0_7], %10 {strides = array<i32>} : memref<2x128xf32, #tpu.memory_space<vmem>>, vector<2x128xf32>,
    %c1_i32 = arith.constant 1 : i32
    %12 = arith.cmpi eq, %arg0, %c1_i32 : i32
    %13 = arith.extui %12 : i1 to i32
    %c0_i32_8 = arith.constant 0 : i32
    %14 = arith.cmpi ne, %13, %c0_i32_8 : i32
    scf.if %14 {
      %c0_9 = arith.constant 0 : index
      %c0_10 = arith.constant 0 : index
      %15 = vector.load %arg9[%c0_9, %c0_10] : memref<2x128xf32, #tpu.memory_space<vmem>>, vector<2x128xf32>
      %c0_11 = arith.constant 0 : index
      %c0_12 = arith.constant 0 : index
      %16 = vector.load %arg3[%c0_11, %c0_12] : memref<1x128xf32, #tpu.memory_space<vmem>>, vector<1x128xf32>
      %17 = vector.broadcast %16 : vector<1x128xf32> to vector<2x128xf32>
      %18 = arith.addf %15, %17 : vector<2x128xf32>
      %cst_13 = arith.constant 0.000000e+00 : f32
      %19 = vector.broadcast %cst_13 : f32 to vector<2x128xf32>
      %20 = arith.maximumf %18, %19 : vector<2x128xf32>
      %c0_14 = arith.constant 0 : index
      %c0_15 = arith.constant 0 : index
      %21 = vector.load %arg4[%c0_14, %c0_15] : memref<128x32xf32, #tpu.memory_space<vmem>>, vector<128x32xf32>
      %cst_16 = arith.constant dense<0.000000e+00> : vector<2x32xf32>
      %22 = tpu.matmul %20, %21, %cst_16 {dimension_numbers = #tpu.dot_dimension_numbers<[1], [0], [0], [1], [0, 0, 1, 1], [], []>} : vector<2x128xf32>, vector<128x32xf32>, vector<2x32xf32> -> vector<2x32xf32>
      %c0_17 = arith.constant 0 : index
      %c0_18 = arith.constant 0 : index
      %23 = vector.load %arg5[%c0_17, %c0_18] : memref<1x32xf32, #tpu.memory_space<vmem>>, vector<1x32xf32>
      %24 = vector.broadcast %23 : vector<1x32xf32> to vector<2x32xf32>
      %25 = arith.addf %22, %24 : vector<2x32xf32>
      %cst_19 = arith.constant 0.000000e+00 : f32
      %26 = vector.broadcast %cst_19 : f32 to vector<2x32xf32>
      %27 = arith.maximumf %25, %26 : vector<2x32xf32>
      %c0_20 = arith.constant 0 : index
      %c0_21 = arith.constant 0 : index
      %28 = vector.load %arg6[%c0_20, %c0_21] : memref<32x1xf32, #tpu.memory_space<vmem>>, vector<32x1xf32>
      %cst_22 = arith.constant dense<0.000000e+00> : vector<2x1xf32>
      %29 = tpu.matmul %27, %28, %cst_22 {dimension_numbers = #tpu.dot_dimension_numbers<[1], [0], [0], [1], [0, 0, 1, 1], [], []>} : vector<2x32xf32>, vector<32x1xf32>, vector<2x1xf32> -> vector<2x1xf32>
      %c0_23 = arith.constant 0 : index
      %c0_24 = arith.constant 0 : index
      %30 = vector.load %arg7[%c0_23, %c0_24] : memref<1x1xf32, #tpu.memory_space<vmem>>, vector<1x1xf32>
      %31 = vector.broadcast %30 : vector<1x1xf32> to vector<2x1xf32>
      %32 = arith.addf %29, %31 : vector<2x1xf32>
      %33 = arith.negf %32 : vector<2x1xf32>
      %34 = math.exp %33 : vector<2x1xf32>
      %cst_25 = arith.constant 1.000000e+00 : f32
      %35 = vector.broadcast %cst_25 : f32 to vector<2x1xf32>
      %36 = arith.addf %35, %34 : vector<2x1xf32>
      %37 = arith.divf %35, %36 : vector<2x1xf32>
      %cst_26 = arith.constant 2.000000e+00 : f32
      %38 = vector.broadcast %cst_26 : f32 to vector<2x1xf32>
      %39 = arith.mulf %38, %37 : vector<2x1xf32>
      %c0_27 = arith.constant 0 : index
      %c0_28 = arith.constant 0 : index
      %40 = vector.load %arg8[%c0_27, %c0_28] : memref<2x1xf32, #tpu.memory_space<vmem>>, vector<2x1xf32>
      tpu.vector_store %arg8[%c0_27, %c0_28], %39 {strides = array<i32>} : memref<2x1xf32, #tpu.memory_space<vmem>>, vector<2x1xf32>,
    } else {
    }
    return
  }
  func.func @transform_0(%arg0: i32) -> (i32, i32, i32) {
    %c0_i32 = arith.constant 0 : i32
    %c0_i32_0 = arith.constant 0 : i32
    %c0_i32_1 = arith.constant 0 : i32
    %c0_i32_2 = arith.constant 0 : i32
    return %c0_i32, %c0_i32_0, %c0_i32_1 : i32, i32, i32
  }
  func.func @transform_1(%arg0: i32) -> (i32, i32) {
    %c0_i32 = arith.constant 0 : i32
    %c0_i32_0 = arith.constant 0 : i32
    return %arg0, %c0_i32 : i32, i32
  }
  func.func @transform_2(%arg0: i32) -> (i32, i32) {
    %c0_i32 = arith.constant 0 : i32
    %c0_i32_0 = arith.constant 0 : i32
    %c0_i32_1 = arith.constant 0 : i32
    return %c0_i32, %c0_i32_0 : i32, i32
  }
  func.func @transform_3(%arg0: i32) -> (i32, i32) {
    %c0_i32 = arith.constant 0 : i32
    %c0_i32_0 = arith.constant 0 : i32
    %c0_i32_1 = arith.constant 0 : i32
    return %c0_i32, %c0_i32_0 : i32, i32
  }
  func.func @transform_4(%arg0: i32) -> (i32, i32) {
    %c0_i32 = arith.constant 0 : i32
    %c0_i32_0 = arith.constant 0 : i32
    %c0_i32_1 = arith.constant 0 : i32
    return %c0_i32, %c0_i32_0 : i32, i32
  }
  func.func @transform_5(%arg0: i32) -> (i32, i32) {
    %c0_i32 = arith.constant 0 : i32
    %c0_i32_0 = arith.constant 0 : i32
    %c0_i32_1 = arith.constant 0 : i32
    return %c0_i32, %c0_i32_0 : i32, i32
  }
  func.func @transform_6(%arg0: i32) -> (i32, i32) {
    %c0_i32 = arith.constant 0 : i32
    %c0_i32_0 = arith.constant 0 : i32
    %c0_i32_1 = arith.constant 0 : i32
    return %c0_i32, %c0_i32_0 : i32, i32
  }
  func.func @transform_7(%arg0: i32) -> (i32, i32) {
    %c0_i32 = arith.constant 0 : i32
    %c0_i32_0 = arith.constant 0 : i32
    %c0_i32_1 = arith.constant 0 : i32
    return %c0_i32, %c0_i32_0 : i32, i32
  }
}

</mosaic_0001>

<bundles_post_ra>
// kernel: tpu_custom_call.1
= control target key start
LH: loop header
LB: loop body
LE: loop exit
PB: predicated region body
PF: predicated region fallthrough
CT: control target
= control target key end

     0   :  { %s7411_s0 = inlined_call_operand.hbm [shape: f32[2,2,6144], index: 0, kind: input, shape index: {}]   ;;  %s7412_s1 = inlined_call_operand.hbm [shape: bf16[12288,128], index: 1, kind: input, shape index: {}]   ;;  %s7413_s2 = inlined_call_operand.hbm [shape: f32[1,128], index: 2, kind: input, shape index: {}]   ;;  %s7414_s3 = inlined_call_operand.vmem [shape: f32[128,32], index: 3, kind: input, shape index: {}]   ;;  %s7415_s4 = inlined_call_operand.hbm [shape: f32[1,32], index: 4, kind: input, shape index: {}]   ;;  %s7416_s5 = inlined_call_operand.vmem [shape: f32[32,1], index: 5, kind: input, shape index: {}]   ;;  %s7417_s6 = inlined_call_operand.<no memory space> [shape: f32[1,1], index: 6, kind: input, shape index: {}]   ;;  %s7418_s7 = inlined_call_operand.vmem [shape: f32[2,1], index: 7, kind: output, shape index: {}]  }
   0x1   :  { %7425 = sst [smem:[#allocation17_spill]] %s7413_s2  ;;  %v12_v0 = vstv %s7417_s6 }
   0x2   :  { %13 = vst [vmem:[#allocation3] sm:$0x1] %v12_v0 }
   0x3   :  { %14 = vsyncpa [#allocation5], 0 }
   0x4   :  { %15 = vsyncpa [#allocation7], 0 }
   0x5   :  { %17 = vsyncpa [#allocation7 + $0x1], 0 }
   0x6   :  { %18 = vsyncpa [#allocation10], 0  ;;  %s6701_s26 = smov 0   ;;  %s6703_s27 = smov 0  }
   0x7   :  { %s6705_s28 = smov 0   ;;  %s6707_s29 = smov 0  }
   0x8 LB: > { %s6720_s6 = sadd.s32 4294967295, %s6643_s29   ;;  %s6723_s30 = sadd.s32 1, %s6643_s29   ;;  %s6643_s29 = sphi %s6707_s29, %s7445_s29   ;;  %s6639_s28 = sphi %s6705_s28, %s7449_s28   ;;  %s6635_s27 = sphi %s6703_s27, %s7448_s27   ;;  %s6631_s26 = sphi %s6701_s26, %s7447_s26  }
   0x9   : > { %7426 = sst [smem:[#allocation15_spill]] %s6723_s30  ;;  %s49_s8 = ssub.s32 %s6643_s29, %s6723_s30 }
   0xa   : > { %s52_s9 = sadd.s32 1, %s6639_s28  ;;  %p50_p0 = scmp.eq.s32.totalorder %s49_s8, 0 }
   0xb   : > { %p59_p1 = scmp.ne.s32.totalorder %s6639_s28, %s6635_s27  ;;  %p60_p2 = scmp.eq.s32.totalorder %s6643_s29, 0 }
   0xc   : > { %p65_p3 = scmp.ne.s32.totalorder %s6635_s27, %s6631_s26  ;;  %p7419_p5 = scmp.eq.s32.totalorder %s6720_s6, 0 }
   0xd   : > { %s6733_s10 = scalar_select %p50_p0, %s6639_s28, %s52_s9  }
   0xe   : > { %p6735_p4 = por %p60_p2, %p59_p1  ;;  %p4970_p6 = scmp.ge.s32.totalorder %s6643_s29, 1 }
   0xf   : > { %7427 = sst [smem:[#allocation16_spill]] %s6733_s10  ;;  %p202_p7 = scmp.lt.s32.totalorder %s6643_s29, 3 }
  0x10   : > { %p6744_p8 = por %p7419_p5, %p65_p3  ;;  %s6645_s14 = smov [#allocation8]  }
  0x11   : > { %p6749_p10 = pnand %p4970_p6, %p202_p7  ;;  %s228_s15 = sshll.u32 %s6645_s14, 4  ;;  %s229_s15 = int_to_ptr.vmem [resolvable:$true] %s228_s15 }
  0x12   : > { %s7429_s12 = scalar_select %p6744_p8, 1, 0 }
  0x13   : > { %s7430_s13 = scalar_select %p6749_p10, 1, 0 }
  0x14   : > { %p6018_p11 = pneg %p6749_p10  ;;  %p6035_p12 = scmp.lt.s32.totalorder %s6643_s29, 2 }
  0x15   : > { %s6646_s17 = smov [#allocation4]   ;;  %s7433_s2 = sld [smem:[#allocation17_spill]] }
  0x16   : > { %p6758_p13 = pnand %p6018_p11, %p7419_p5  ;;  %s214_s18 = sshll.u32 %s6646_s17, 4  ;;  %s6768_s18 = int_to_ptr.vmem [resolvable:$true] %s214_s18 }
  0x17   : > { %p6764_p0 = pnand %p6035_p12, %p6735_p4 }
  0x18   : > { %p6778_p2 = pneg %p6758_p13 }
  0x19   : > { %s7432_s19 = scalar_select %p6764_p0, 1, 0 }
  0x1b   : > { %s6483_s22 = scalar_lea.hbm %s7433_s2, 16 }
  0x1c   : > { %p6484_p1 = scmp.ne.s32.totalorder %s7433_s2, %s6483_s22  ;;  %p6490_p6 = scmp.lt.u32.totalorder %s6483_s22, %s7433_s2 }
  0x1e   : > { %p6486_p3 = pnand %p6778_p2, %p6484_p1 }
  0x20   : > { %p6487_p4 = pneg %p6486_p3 }
  0x22   : > { %p6492_p7 = pnand %p6490_p6, %p6487_p4 }
  0x24   : > { %6495 = shalt.err (!%p6492_p7)
}
  0x25   : > { %s6496_s9 = scalar_lea.vmem %s229_s15, 16  ;;  %s6503_s11 = scalar_lea.vmem %s229_s15, 32 }
  0x26   : > { %p6497_p11 = scmp.ne.s32.totalorder %s229_s15, %s6496_s9  ;;  %p6504_p5 = scmp.lt.s32.totalorder %s229_s15, %s229_s15 }
  0x27   : > { %p6505_p8 = scmp.lt.s32.totalorder %s6503_s11, %s6496_s9 }
  0x28   : > { %p6499_p12 = pnand %p6497_p11, %p6778_p2 }
  0x29   : > { %p6506_p10 = por %p6505_p8, %p6504_p5 }
  0x2a   : > { %p6500_p9 = pneg %p6499_p12 }
  0x2c   : > { %p6507_p0 = pnand %p6506_p10, %p6500_p9 }
  0x2e   : > { %6510 = shalt.err (!%p6507_p0)
}
  0x2f   : > { %6024 = dma.hbm_to_vmem [thread:$0]  (!%p6758_p13), %s7433_s2, 16, %s229_s15, [#allocation7]  }
  0x30   : > { %s6511_s22 = scalar_lea.hbm %s7411_s0, 3072 }
  0x31   : > { %p6512_p1 = scmp.ne.s32.totalorder %s7411_s0, %s6511_s22  ;;  %p6518_p8 = scmp.lt.u32.totalorder %s6511_s22, %s7411_s0 }
  0x33   : > { %p6514_p3 = pnand %p6512_p1, %p6778_p2 }
  0x35   : > { %p6515_p5 = pneg %p6514_p3 }
  0x37   : > { %p6520_p9 = pnand %p6518_p8, %p6515_p5 }
  0x39   : > { %6523 = shalt.err (!%p6520_p9)
}
  0x3a   : > { %s6524_s15 = scalar_lea.vmem %s6768_s18, 3072  ;;  %p6532_p6 = scmp.lt.s32.totalorder %s6768_s18, %s6768_s18 }
  0x3b   : > { %p6525_p10 = scmp.ne.s32.totalorder %s6768_s18, %s6524_s15  ;;  %p6533_p7 = scmp.lt.s32.totalorder %s6524_s15, %s6524_s15 }
  0x3d   : > { %p6527_p0 = pnand %p6525_p10, %p6778_p2  ;;  %p6534_p11 = por %p6533_p7, %p6532_p6 }
  0x3f   : > { %p6528_p4 = pneg %p6527_p0 }
  0x41   : > { %p6535_p12 = pnand %p6534_p11, %p6528_p4 }
  0x43   : > { %6538 = shalt.err (!%p6535_p12)
}
  0x44   : > { %s6647_s9 = smov 1536   ;;  %s6648_s11 = smov 96  }
  0x45   : > { %6021 = dma.hbm_to_vmem [thread:$0]  (!%p6758_p13), %s7411_s0, 3072, %s6768_s18, [#allocation5], %s6647_s9, %s6647_s9, %s6648_s11  }
  0x46   : > { %s6649_s20 = smov [#allocation9]   ;;  %s259_s22 = sand.u32 1, %s6643_s29  }
  0x47   : > { %s242_s21 = sshll.u32 %s6649_s20, 4  ;;  %s261_s23 = sand.u32 1, %s6639_s28   ;;  %s243_s21 = int_to_ptr.vmem [resolvable:$true] %s242_s21 }
  0x48   : > { %s6539_s8 = scalar_lea.hbm %s7415_s4, 16 }
  0x49   : > { %p6540_p1 = scmp.ne.s32.totalorder %s7415_s4, %s6539_s8  ;;  %p6546_p8 = scmp.lt.u32.totalorder %s6539_s8, %s7415_s4 }
  0x4b   : > { %p6542_p3 = pnand %p6540_p1, %p6778_p2 }
  0x4d   : > { %p6543_p5 = pneg %p6542_p3 }
  0x4f   : > { %p6548_p9 = pnand %p6546_p8, %p6543_p5 }
  0x51   : > { %6551 = shalt.err (!%p6548_p9)
}
  0x52   : > { %s6552_s18 = scalar_lea.vmem %s243_s21, 16  ;;  %s6559_s9 = scalar_lea.vmem %s243_s21, 32 }
  0x53   : > { %p6553_p10 = scmp.ne.s32.totalorder %s243_s21, %s6552_s18  ;;  %p6560_p6 = scmp.lt.s32.totalorder %s243_s21, %s243_s21 }
  0x54   : > { %p6561_p7 = scmp.lt.s32.totalorder %s6559_s9, %s6552_s18 }
  0x55   : > { %p6555_p0 = pnand %p6553_p10, %p6778_p2 }
  0x56   : > { %p6562_p11 = por %p6561_p7, %p6560_p6 }
  0x57   : > { %p6556_p4 = pneg %p6555_p0 }
  0x59   : > { %p6563_p12 = pnand %p6562_p11, %p6556_p4 }
  0x5b   : > { %6566 = shalt.err (!%p6563_p12)
}
  0x5c   : > { %6027 = dma.hbm_to_vmem [thread:$0]  (!%p6758_p13), %s7415_s4, 16, %s243_s21, [#allocation10]  }
  0x5d   : > { %s6002_s30 = smul.u32 3072, %s261_s23  ;;  %s6845_s24 = scalar_lea.sflag [#allocation7], %s259_s22 }
  0x5e   : > { %s5374_s10 = smul.u32 49152, %s6643_s29  ;;  %p7435_p13 = scmp.ne.s32.totalorder %s7432_s19, 0 }
  0x5f   : > { %s263_s20 = scalar_lea.vmem [#allocation6], %s6002_s30  ;;  %s6572_s23 = scalar_lea.hbm %s7412_s1, 98304 }
  0x60   : > { %s6841_s17 = scalar_lea.hbm %s7412_s1, %s5374_s10  ;;  %s270_s16 = sshll.u32 %s263_s20, 4  ;;  %s6843_s16 = int_to_ptr.vmem [resolvable:$true] %s270_s16 }
  0x61   : > { %s6567_s26 = scalar_lea.hbm %s6841_s17, 49152  ;;  %p6569_p1 = pneg %p7435_p13 }
  0x62   : > { %p6568_p2 = scmp.ne.s32.totalorder %s6841_s17, %s6567_s26  ;;  %p6573_p8 = scmp.lt.u32.totalorder %s6841_s17, %s7412_s1 }
  0x63   : > { %p6574_p9 = scmp.lt.u32.totalorder %s6572_s23, %s6567_s26  ;;  %p6576_p0 = scmp.lt.u32.totalorder %s6567_s26, %s6841_s17 }
  0x64   : > { %p6570_p3 = pnand %p6569_p1, %p6568_p2 }
  0x65   : > { %p6575_p10 = por %p6574_p9, %p6573_p8 }
  0x66   : > { %p6571_p5 = pneg %p6570_p3 }
  0x67   : > { %p6577_p4 = por %p6576_p0, %p6575_p10 }
  0x69   : > { %p6578_p6 = pnand %p6577_p4, %p6571_p5 }
  0x6b   : > { %6581 = shalt.err (!%p6578_p6)
}
  0x6c   : > { %s6582_s22 = scalar_lea.vmem %s6843_s16, 49152  ;;  %s6650_s18 = smov [#allocation6]  }
  0x6d   : > { %p6583_p7 = scmp.ne.s32.totalorder %s6843_s16, %s6582_s22  ;;  %s6587_s9 = sshll.u32 %s6650_s18, 4  ;;  %s6588_s9 = int_to_ptr.vmem [resolvable:$false] %s6587_s9 }
  0x6e   : > { %s6589_s2 = scalar_lea.vmem %s6588_s9, 98304  ;;  %p6590_p2 = scmp.lt.s32.totalorder %s6843_s16, %s6588_s9 }
  0x6f   : > { %p6585_p11 = pnand %p6583_p7, %p6569_p1  ;;  %p6591_p3 = scmp.lt.s32.totalorder %s6589_s2, %s6582_s22 }
  0x71   : > { %p6586_p12 = pneg %p6585_p11  ;;  %p6592_p8 = por %p6591_p3, %p6590_p2 }
  0x73   : > { %p6593_p9 = pnand %p6592_p8, %p6586_p12 }
  0x75   : > { %6596 = shalt.err (!%p6593_p9)
}
  0x76   : > { %s6651_s11 = smov 64   ;;  %s6652_s30 = smov 4  }
  0x77   : > { %6031 = dma.hbm_to_vmem [thread:$0]  (!%p7435_p13), %s6841_s17, 49152, %s6843_s16, %s6845_s24, %s6651_s11, %s6651_s11, %s6652_s30  }
  0x78   : > { %p7436_p1 = scmp.ne.s32.totalorder %s7430_s13, 0 }
  0x79   : > { %p7437_p5 = scmp.eq.s32.totalorder (!%p7436_p1), %s6720_s6, 0 }
  0x7a   : > { %282 = sbr.rel (%p7436_p1) target bundleno = 1228 (0x4cc), region = 48 }
  0x81   : > { %6614 = dma.done.wait (%p7437_p5), [#allocation5], 3072   ;;  %p7438_p10 = pmov %p7437_p5 }
  0x82   : > { %s288_s10 = sand.u32 1, %s6720_s6   ;;  %s290_s25 = sand.u32 1, %s6635_s27  }
  0x83   : > { %6616 = vsyncadd (%p7438_p10), [#allocation5], 4294964224  ;;  %s6003_s14 = smul.u32 3072, %s290_s25  ;;  %s289_s20 = scalar_lea.sflag [#allocation7], %s288_s10 }
  0x84   : > { %p7439_p0 = scmp.ne.s32.totalorder %s7429_s12, 0 }
  0x85   : > { %s6881_s26 = scalar_lea.vmem [#allocation6], %s6003_s14 }
  0x86   : > { %6618 = dma.done.wait (%p7439_p0), %s289_s20, 49152  }
  0x87   : > { %6620 = vsyncadd (%p7439_p0), %s289_s20, 4294918144  ;;  %p7440_p13 = pmov %p7437_p5 }
  0x88   : > { %p7441_p4 = pmov %p7437_p5 }
  0x89   : > { %6622 = dma.done.wait (%p7440_p13), [#allocation7], 16  }
  0x8a   : > { %6624 = vsyncadd (%p7441_p4), [#allocation7], 4294967280  ;;  %p7442_p6 = pmov %p7441_p4 }
  0x8b   : > { %p7443_p7 = pmov %p7441_p4 }
  0x8c   : > { %6626 = dma.done.wait (%p7442_p6), [#allocation10], 16  }
  0x8d   : > { %6628 = vsyncadd (%p7443_p7), [#allocation10], 4294967280  ;;  %p7444_p11 = scmp.ne.s32.totalorder %s6720_s6, 0 }
  0x8e   : > { %v6653_v1 = vmov (!%p7444_p11), 0.0  }
  0x8f   : > { %331 = sbr.rel (%p7444_p11) target bundleno = 150 (0x96), region = 68  ;;  %332 = vst [vmem:[#allocation2] sm:$0x3] (!%p7444_p11), %v6653_v1 }
  0x96 PF: > { %v6083_v2 = vld [vmem:[%s6881_s26 + $0x40] sm:$0xff]   ;;  %v6087_v6 = vld [vmem:[%s6881_s26 + $0x48] sm:$0xff]   ;;  %v6091_v10 = vld [vmem:[%s6881_s26 + $0x50] sm:$0xff]   ;;  %s5375_s12 = smul.u32 96, %s6720_s6  ;;  %v365_v30 = vlaneseq  ;;  %v6654_v38 = vmov 1983009808  }
  0x97   : > { %v6084_v3 = vld [vmem:[%s6881_s26 + $0xc0] sm:$0xff]   ;;  %5376 = vmatprep.subr.bf16.mxu0 %v6083_v2  ;;  %v6088_v7 = vld [vmem:[%s6881_s26 + $0xc8] sm:$0xff]   ;;  %v6092_v11 = vld [vmem:[%s6881_s26 + $0xd0] sm:$0xff]   ;;  %v363_v39 = vunpack.c.l.s4 %v6654_v38  ;;  %p5366_p12 = scmp.ne.s32.totalorder %s6720_s6, 1 }
  0x98   : > { %v6085_v4 = vld [vmem:[%s6881_s26] sm:$0xff]   ;;  %5398 = vmatprep.subr.bf16.mxu1 %v6084_v3  ;;  %v6089_v8 = vld [vmem:[%s6881_s26 + $0x8] sm:$0xff]   ;;  %v6093_v12 = vld [vmem:[%s6881_s26 + $0x10] sm:$0xff]   ;;  %v366_v35 = vshrl.u32 %v365_v30, 7  ;;  %s6930_s13 = scalar_lea.vmem [#allocation4], %s5375_s12  ;;  %vm6656_vm0 = vmmov (!%p5366_p12), 0  }
  0x99   : > { %v6086_v5 = vld [vmem:[%s6881_s26 + $0x80] sm:$0xff]   ;;  %5377 = vmatpush3.bf16.msra.mxu0 %v6085_v4  ;;  %v6090_v9 = vld [vmem:[%s6881_s26 + $0x88] sm:$0xff]   ;;  %v6094_v13 = vld [vmem:[%s6881_s26 + $0x90] sm:$0xff]   ;;  %v364_v41 = vunpack.c.0.s8 %v363_v39  ;;  %vm4814_vm1 = vcmask (!%p5366_p12), 261120   ;;  %vm4895_vm2 = vcmask (!%p5366_p12), 1024  }
  0x9a   : > { %5399 = vmatpush3.bf16.msra.mxu1 %v6086_v5  ;;  %5378 = vmatprep.subr.bf16.mxu0 %v6087_v6  ;;  %v6095_v14 = vld [vmem:[%s6881_s26 + $0x58] sm:$0xff]   ;;  %v6099_v18 = vld [vmem:[%s6881_s26 + $0x60] sm:$0xff]   ;;  %v6103_v22 = vld [vmem:[%s6881_s26 + $0x68] sm:$0xff]  }
  0x9b   : > { %5400 = vmatprep.subr.bf16.mxu1 %v6088_v7  ;;  %v6096_v15 = vld [vmem:[%s6881_s26 + $0xd8] sm:$0xff]   ;;  %v6100_v19 = vld [vmem:[%s6881_s26 + $0xe0] sm:$0xff]   ;;  %v6104_v23 = vld [vmem:[%s6881_s26 + $0xe8] sm:$0xff]   ;;  %v6935_v43 = vsub.s32 %v364_v41, %v366_v35 }
  0x9c   : > { %v6097_v16 = vld [vmem:[%s6881_s26 + $0x18] sm:$0xff]   ;;  %v6101_v20 = vld [vmem:[%s6881_s26 + $0x20] sm:$0xff]   ;;  %v6105_v24 = vld [vmem:[%s6881_s26 + $0x28] sm:$0xff]  }
  0x9d   : > { %5379 = vmatpush3.bf16.msra.mxu0 %v6089_v8  ;;  %v6098_v17 = vld [vmem:[%s6881_s26 + $0x98] sm:$0xff]   ;;  %v6102_v21 = vld [vmem:[%s6881_s26 + $0xa0] sm:$0xff]   ;;  %v6106_v25 = vld [vmem:[%s6881_s26 + $0xa8] sm:$0xff]  }
  0x9e   : > { %5401 = vmatpush3.bf16.msra.mxu1 %v6090_v9  ;;  %5380 = vmatprep.subr.bf16.mxu0 %v6091_v10  ;;  %v6107_v26 = vld [vmem:[%s6881_s26 + $0x70] sm:$0xff]   ;;  %v6111_v31 = vld [vmem:[%s6881_s26 + $0x78] sm:$0xff]   ;;  %v6116_v37 = vld [vmem:[%s6881_s26 + $0x140] sm:$0xff]  }
  0x9f   : > { %5402 = vmatprep.subr.bf16.mxu1 %v6092_v11  ;;  %v6108_v27 = vld [vmem:[%s6881_s26 + $0xf0] sm:$0xff]   ;;  %v6112_v32 = vld [vmem:[%s6881_s26 + $0xf8] sm:$0xff]   ;;  %v6117_v40 = vld [vmem:[%s6881_s26 + $0x1c0] sm:$0xff]  }
  0xa0   : > { %v6109_v28 = vld [vmem:[%s6881_s26 + $0x30] sm:$0xff]   ;;  %v6113_v33 = vld [vmem:[%s6881_s26 + $0x38] sm:$0xff]   ;;  %v6118_v48 = vld [vmem:[%s6881_s26 + $0x100] sm:$0xff]  }
  0xa1   : > { %5381 = vmatpush3.bf16.msra.mxu0 %v6093_v12  ;;  %v6110_v29 = vld [vmem:[%s6881_s26 + $0xb0] sm:$0xff]   ;;  %v6114_v34 = vld [vmem:[%s6881_s26 + $0xb8] sm:$0xff]   ;;  %v6119_v51 = vld [vmem:[%s6881_s26 + $0x180] sm:$0xff]  }
  0xa2   : > { %5403 = vmatpush3.bf16.msra.mxu1 %v6094_v13  ;;  %5382 = vmatprep.subr.bf16.mxu0 %v6095_v14  ;;  %v336_v36 = vld [vmem:[%s6930_s13] sm:$0xff]  ;;  %v6120_v54 = vld [vmem:[%s6881_s26 + $0x148] sm:$0xff]   ;;  %v6124_v58 = vld [vmem:[%s6881_s26 + $0x150] sm:$0xff]  }
  0xa3   : > { %5404 = vmatprep.subr.bf16.mxu1 %v6096_v15  ;;  %v361_v42 = vcombine.high %v336_v36, %v336_v36  ;;  %v368_v44 = vrot.slane %v336_v36, %v6935_v43  ;;  %v6121_v55 = vld [vmem:[%s6881_s26 + $0x1c8] sm:$0xff]   ;;  %v6125_v59 = vld [vmem:[%s6881_s26 + $0x1d0] sm:$0xff]   ;;  %v6128_v62 = vld [vmem:[%s6881_s26 + $0x158] sm:$0xff]  }
  0xa4   : > { %v6122_v56 = vld [vmem:[%s6881_s26 + $0x108] sm:$0xff]   ;;  %v6126_v60 = vld [vmem:[%s6881_s26 + $0x110] sm:$0xff]   ;;  %v6129_v63 = vld [vmem:[%s6881_s26 + $0x1d8] sm:$0xff]  }
  0xa5   : > { %5383 = vmatpush3.bf16.msra.mxu0 %v6097_v16  ;;  %v375_v45 = vrot.slane %v361_v42, %v6935_v43  ;;  %v376_v46 = vcombine.high %v368_v44, %v368_v44  ;;  %v613_v49 = vpack.c.bf16 %v368_v44, %v368_v44  ;;  %v6123_v57 = vld [vmem:[%s6881_s26 + $0x188] sm:$0xff]   ;;  %v6127_v61 = vld [vmem:[%s6881_s26 + $0x190] sm:$0xff]   ;;  %v6130_v0 = vld [vmem:[%s6881_s26 + $0x118] sm:$0xff]  }
  0xa6   : > { %5405 = vmatpush3.bf16.msra.mxu1 %v6098_v17  ;;  %5384 = vmatprep.subr.bf16.mxu0 %v6099_v18  ;;  %v6131_v1 = vld [vmem:[%s6881_s26 + $0x198] sm:$0xff]   ;;  %v6132_v2 = vld [vmem:[%s6881_s26 + $0x160] sm:$0xff]   ;;  %v6136_v6 = vld [vmem:[%s6881_s26 + $0x168] sm:$0xff]  }
  0xa7   : > { %5406 = vmatprep.subr.bf16.mxu1 %v6100_v19  ;;  %v377_v47 = vcombine.high %v375_v45, %v375_v45  ;;  %v615_v50 = vpack.c.bf16 %v375_v45, %v375_v45  ;;  %v614_v52 = vpack.c.bf16 %v376_v46, %v376_v46  ;;  %v6133_v3 = vld [vmem:[%s6881_s26 + $0x1e0] sm:$0xff]   ;;  %v6137_v7 = vld [vmem:[%s6881_s26 + $0x1e8] sm:$0xff]   ;;  %v6140_v10 = vld [vmem:[%s6881_s26 + $0x170] sm:$0xff]  }
  0xa8   : > { %v6134_v4 = vld [vmem:[%s6881_s26 + $0x120] sm:$0xff]   ;;  %v6138_v8 = vld [vmem:[%s6881_s26 + $0x128] sm:$0xff]   ;;  %v6141_v11 = vld [vmem:[%s6881_s26 + $0x1f0] sm:$0xff]  }
  0xa9   : > { %5385 = vmatpush3.bf16.msra.mxu0 %v6101_v20  ;;  %v616_v53 = vpack.c.bf16 %v377_v47, %v377_v47  ;;  %3765 = vmatprep.mubr.bf16.mxu0 %v614_v52  ;;  %v6135_v5 = vld [vmem:[%s6881_s26 + $0x1a0] sm:$0xff]   ;;  %v6139_v9 = vld [vmem:[%s6881_s26 + $0x1a8] sm:$0xff]   ;;  %v6142_v13 = vld [vmem:[%s6881_s26 + $0x130] sm:$0xff]  }
  0xaa   : > { %5407 = vmatpush3.bf16.msra.mxu1 %v6102_v21  ;;  %5386 = vmatprep.subr.bf16.mxu0 %v6103_v22  ;;  %v337_v12 = vld [vmem:[%s6930_s13 + $0x8] sm:$0xff]  ;;  %v6143_v16 = vld [vmem:[%s6881_s26 + $0x1b0] sm:$0xff]   ;;  %v6144_v17 = vld [vmem:[%s6881_s26 + $0x178] sm:$0xff]  }
  0xab   : > { %5408 = vmatprep.subr.bf16.mxu1 %v6104_v23  ;;  %3805 = vmatprep.mubr.bf16.mxu1 %v616_v53  ;;  %v385_v14 = vrot.slane %v337_v12, %v6935_v43  ;;  %v378_v15 = vcombine.high %v337_v12, %v337_v12  ;;  %v6145_v20 = vld [vmem:[%s6881_s26 + $0x1f8] sm:$0xff]   ;;  %v6156_v35 = vld [vmem:[%s6881_s26 + $0x288] sm:$0xff]   ;;  %v6157_v36 = vld [vmem:[%s6881_s26 + $0x250] sm:$0xff]  }
  0xac   : > { %v6146_v21 = vld [vmem:[%s6881_s26 + $0x138] sm:$0xff]   ;;  %v6159_v38 = vld [vmem:[%s6881_s26 + $0x210] sm:$0xff]   ;;  %v6165_v45 = vld [vmem:[%s6881_s26 + $0x260] sm:$0xff]  }
  0xad   : > { %5387 = vmatpush3.bf16.msra.mxu0 %v6105_v24  ;;  %v393_v18 = vcombine.high %v385_v14, %v385_v14  ;;  %v392_v19 = vrot.slane %v378_v15, %v6935_v43  ;;  %v6147_v24 = vld [vmem:[%s6881_s26 + $0x1b8] sm:$0xff]   ;;  %v6160_v39 = vld [vmem:[%s6881_s26 + $0x290] sm:$0xff]   ;;  %v6166_v46 = vld [vmem:[%s6881_s26 + $0x2e0] sm:$0xff]  }
  0xae   : > { %5409 = vmatpush3.bf16.msra.mxu1 %v6106_v25  ;;  %5388 = vmatprep.subr.bf16.mxu0 %v6107_v26  ;;  %v6149_v26 = vld [vmem:[%s6881_s26 + $0x240] sm:$0xff]   ;;  %v6162_v41 = vld [vmem:[%s6881_s26 + $0x2d8] sm:$0xff]   ;;  %v6172_v52 = vld [vmem:[%s6881_s26 + $0x2a8] sm:$0xff]  }
  0xaf   : > { %5410 = vmatprep.subr.bf16.mxu1 %v6108_v27  ;;  %v618_v22 = vpack.c.bf16 %v393_v18, %v393_v18  ;;  %v394_v23 = vcombine.high %v392_v19, %v392_v19  ;;  %v6150_v27 = vld [vmem:[%s6881_s26 + $0x2c0] sm:$0xff]   ;;  %v619_v30 = vpack.c.bf16 %v392_v19, %v392_v19  ;;  %v6163_v42 = vld [vmem:[%s6881_s26 + $0x218] sm:$0xff]   ;;  %v6173_v53 = vld [vmem:[%s6881_s26 + $0x270] sm:$0xff]  }
  0xb0   : > { %v6164_v44 = vld [vmem:[%s6881_s26 + $0x298] sm:$0xff]   ;;  %v6167_v47 = vld [vmem:[%s6881_s26 + $0x220] sm:$0xff]   ;;  %v6187_v12 = vld [vmem:[%s6881_s26 + $0x3c8] sm:$0xff]  }
  0xb1   : > { %5389 = vmatpush3.bf16.msra.mxu0 %v6109_v28  ;;  %v620_v25 = vpack.c.bf16 %v394_v23, %v394_v23  ;;  %v6151_v28 = vld [vmem:[%s6881_s26 + $0x200] sm:$0xff]   ;;  %v6190_v15 = vld [vmem:[%s6881_s26 + $0x350] sm:$0xff]   ;;  %v6194_v19 = vld [vmem:[%s6881_s26 + $0x358] sm:$0xff]  }
  0xb2   : > { %5411 = vmatpush3.bf16.msra.mxu1 %v6110_v29  ;;  %5390 = vmatprep.subr.bf16.mxu0 %v6111_v31  ;;  %v617_v29 = vpack.c.bf16 %v385_v14, %v385_v14  ;;  %v6152_v31 = vld [vmem:[%s6881_s26 + $0x280] sm:$0xff]   ;;  %v6189_v14 = vld [vmem:[%s6881_s26 + $0x388] sm:$0xff]   ;;  %v6193_v18 = vld [vmem:[%s6881_s26 + $0x390] sm:$0xff]  }
  0xb3   : > { %5412 = vmatprep.subr.bf16.mxu1 %v6112_v32  ;;  %v6153_v32 = vld [vmem:[%s6881_s26 + $0x248] sm:$0xff]   ;;  %v6198_v23 = vld [vmem:[%s6881_s26 + $0x360] sm:$0xff]  }
  0xb5   : > { %5391 = vmatpush3.bf16.msra.mxu0 %v6113_v33  ;;  %v6154_v33 = vld [vmem:[%s6881_s26 + $0x2c8] sm:$0xff]  }
  0xb6   : > { %5413 = vmatpush3.bf16.msra.mxu1 %v6114_v34  ;;  %5420 = vmatprep.subr.bf16.mxu0 %v6116_v37  ;;  %v6155_v34 = vld [vmem:[%s6881_s26 + $0x208] sm:$0xff]   ;;  %v6158_v37 = vld [vmem:[%s6881_s26 + $0x2d0] sm:$0xff]  }
  0xb7   : > { %5442 = vmatprep.subr.bf16.mxu1 %v6117_v40  ;;  %v6161_v40 = vld [vmem:[%s6881_s26 + $0x258] sm:$0xff]  }
  0xb8   : > { %3766 = vmatmul.mubr.bf16.vlgmr.msra.gmra.mrb[0].mxu0 %v613_v49  ;;  %v6169_v49 = vld [vmem:[%s6881_s26 + $0x268] sm:$0xff]  }
  0xb9   : > { %3806 = vmatmul.mubr.bf16.vlgmr.msra.gmra.mrb[0].mxu1 %v615_v50  ;;  %5421 = vmatpush3.bf16.msra.mxu0 %v6118_v48  ;;  %v6168_v48 = vld [vmem:[%s6881_s26 + $0x2a0] sm:$0xff]   ;;  %v6170_v50 = vld [vmem:[%s6881_s26 + $0x2e8] sm:$0xff]  }
  0xba   : > { %5443 = vmatpush3.bf16.msra.mxu1 %v6119_v51  ;;  %5422 = vmatprep.subr.bf16.mxu0 %v6120_v54  ;;  %v6171_v51 = vld [vmem:[%s6881_s26 + $0x228] sm:$0xff]   ;;  %v6174_v54 = vld [vmem:[%s6881_s26 + $0x2f0] sm:$0xff]  }
  0xbb   : > { %5444 = vmatprep.subr.bf16.mxu1 %v6121_v55  ;;  %3845 = vmatprep.mubr.bf16.mxu0 %v618_v22  ;;  %v338_v55 = vld [vmem:[%s6930_s13 + $0x10] sm:$0xff]  ;;  %v6197_v22 = vld [vmem:[%s6881_s26 + $0x398] sm:$0xff]  }
  0xbc   : > { %3885 = vmatprep.mubr.bf16.mxu1 %v620_v25  ;;  %v6200_v25 = vld [vmem:[%s6881_s26 + $0x320] sm:$0xff]  }
  0xbd   : > { %5423 = vmatpush3.bf16.msra.mxu0 %v6122_v56  ;;  %v6175_v56 = vld [vmem:[%s6881_s26 + $0x230] sm:$0xff]  }
  0xbe   : > { %5445 = vmatpush3.bf16.msra.mxu1 %v6123_v57  ;;  %5424 = vmatprep.subr.bf16.mxu0 %v6124_v58  ;;  %v402_v57 = vrot.slane %v338_v55, %v6935_v43  ;;  %v395_v58 = vcombine.high %v338_v55, %v338_v55  ;;  %v6220_v55 = vld [vmem:[%s6881_s26 + $0x4c8] sm:$0xff]  }
  0xbf   : > { %5446 = vmatprep.subr.bf16.mxu1 %v6125_v59  ;;  %v6176_v59 = vld [vmem:[%s6881_s26 + $0x2b0] sm:$0xff]  }
  0xc1   : > { %5425 = vmatpush3.bf16.msra.mxu0 %v6126_v60  ;;  %v6177_v60 = vld [vmem:[%s6881_s26 + $0x278] sm:$0xff]  }
  0xc2   : > { %5447 = vmatpush3.bf16.msra.mxu1 %v6127_v61  ;;  %5426 = vmatprep.subr.bf16.mxu0 %v6128_v62  ;;  %v410_v61 = vcombine.high %v402_v57, %v402_v57  ;;  %v409_v62 = vrot.slane %v395_v58, %v6935_v43  ;;  %v6223_v58 = vld [vmem:[%s6881_s26 + $0x450] sm:$0xff]  }
  0xc3   : > { %5448 = vmatprep.subr.bf16.mxu1 %v6129_v63  ;;  %v6178_v63 = vld [vmem:[%s6881_s26 + $0x2f8] sm:$0xff]  }
  0xc5   : > { %5427 = vmatpush3.bf16.msra.mxu0 %v6130_v0  ;;  %v6179_v0 = vld [vmem:[%s6881_s26 + $0x238] sm:$0xff]  }
  0xc6   : > { %5449 = vmatpush3.bf16.msra.mxu1 %v6131_v1  ;;  %5428 = vmatprep.subr.bf16.mxu0 %v6132_v2  ;;  %v622_v1 = vpack.c.bf16 %v410_v61, %v410_v61  ;;  %v411_v2 = vcombine.high %v409_v62, %v409_v62  ;;  %v6226_v61 = vld [vmem:[%s6881_s26 + $0x490] sm:$0xff]  }
  0xc7   : > { %5450 = vmatprep.subr.bf16.mxu1 %v6133_v3  ;;  %v6180_v3 = vld [vmem:[%s6881_s26 + $0x2b8] sm:$0xff]  }
  0xc9   : > { %5429 = vmatpush3.bf16.msra.mxu0 %v6134_v4  ;;  %v624_v4 = vpack.c.bf16 %v411_v2, %v411_v2  ;;  %v6231_v2 = vld [vmem:[%s6881_s26 + $0x460] sm:$0xff]  }
  0xca   : > { %5451 = vmatpush3.bf16.msra.mxu1 %v6135_v5  ;;  %5430 = vmatprep.subr.bf16.mxu0 %v6136_v6  ;;  %v6182_v5 = vld [vmem:[%s6881_s26 + $0x340] sm:$0xff]  }
  0xcb   : > { %5452 = vmatprep.subr.bf16.mxu1 %v6137_v7  ;;  %v6183_v6 = vld [vmem:[%s6881_s26 + $0x3c0] sm:$0xff]  }
  0xcc   : > { %v6184_v7 = vld [vmem:[%s6881_s26 + $0x300] sm:$0xff]  }
  0xcd   : > { %5431 = vmatpush3.bf16.msra.mxu0 %v6138_v8  ;;  %v621_v8 = vpack.c.bf16 %v402_v57, %v402_v57  ;;  %v6222_v57 = vld [vmem:[%s6881_s26 + $0x488] sm:$0xff]  }
  0xce   : > { %5453 = vmatpush3.bf16.msra.mxu1 %v6139_v9  ;;  %5432 = vmatprep.subr.bf16.mxu0 %v6140_v10  ;;  %v623_v9 = vpack.c.bf16 %v409_v62, %v409_v62  ;;  %v6185_v10 = vld [vmem:[%s6881_s26 + $0x380] sm:$0xff]   ;;  %v6227_v62 = vld [vmem:[%s6881_s26 + $0x458] sm:$0xff]  }
  0xcf   : > { %5454 = vmatprep.subr.bf16.mxu1 %v6141_v11  ;;  %v6186_v11 = vld [vmem:[%s6881_s26 + $0x348] sm:$0xff]  }
  0xd1   : > { %5433 = vmatpush3.bf16.msra.mxu0 %v6142_v13  ;;  %v6188_v13 = vld [vmem:[%s6881_s26 + $0x308] sm:$0xff]  }
  0xd2   : > { %5455 = vmatpush3.bf16.msra.mxu1 %v6143_v16  ;;  %5434 = vmatprep.subr.bf16.mxu0 %v6144_v17  ;;  %v6191_v16 = vld [vmem:[%s6881_s26 + $0x3d0] sm:$0xff]  }
  0xd3   : > { %5456 = vmatprep.subr.bf16.mxu1 %v6145_v20  ;;  %v6192_v17 = vld [vmem:[%s6881_s26 + $0x310] sm:$0xff]   ;;  %v6195_v20 = vld [vmem:[%s6881_s26 + $0x3d8] sm:$0xff]  }
  0xd5   : > { %5435 = vmatpush3.bf16.msra.mxu0 %v6146_v21  ;;  %v6196_v21 = vld [vmem:[%s6881_s26 + $0x318] sm:$0xff]  }
  0xd6   : > { %5457 = vmatpush3.bf16.msra.mxu1 %v6147_v24  ;;  %5464 = vmatprep.subr.bf16.mxu0 %v6149_v26  ;;  %v6199_v24 = vld [vmem:[%s6881_s26 + $0x3e0] sm:$0xff]  }
  0xd7   : > { %5486 = vmatprep.subr.bf16.mxu1 %v6150_v27  ;;  %v6201_v26 = vld [vmem:[%s6881_s26 + $0x3a0] sm:$0xff]   ;;  %v6202_v27 = vld [vmem:[%s6881_s26 + $0x368] sm:$0xff]  }
  0xd8   : > { %3846 = vmatmul.mubr.bf16.vlgmr.msra.gmra.mrb[4].mxu0 %v617_v29  ;;  %v6204_v29 = vld [vmem:[%s6881_s26 + $0x328] sm:$0xff]  }
  0xd9   : > { %3886 = vmatmul.mubr.bf16.vlgmr.msra.gmra.mrb[4].mxu1 %v619_v30  ;;  %5465 = vmatpush3.bf16.msra.mxu0 %v6151_v28  ;;  %v6203_v28 = vld [vmem:[%s6881_s26 + $0x3e8] sm:$0xff]  }
  0xda   : > { %5487 = vmatpush3.bf16.msra.mxu1 %v6152_v31  ;;  %5466 = vmatprep.subr.bf16.mxu0 %v6153_v32  ;;  %v6205_v30 = vld [vmem:[%s6881_s26 + $0x3a8] sm:$0xff]   ;;  %v6206_v31 = vld [vmem:[%s6881_s26 + $0x370] sm:$0xff]  }
  0xdb   : > { %5488 = vmatprep.subr.bf16.mxu1 %v6154_v33  ;;  %3925 = vmatprep.mubr.bf16.mxu0 %v622_v1  ;;  %v6207_v32 = vld [vmem:[%s6881_s26 + $0x3f0] sm:$0xff]   ;;  %v6230_v1 = vld [vmem:[%s6881_s26 + $0x498] sm:$0xff]  }
  0xdc   : > { %3965 = vmatprep.mubr.bf16.mxu1 %v624_v4  ;;  %v6208_v33 = vld [vmem:[%s6881_s26 + $0x330] sm:$0xff]   ;;  %v6233_v4 = vld [vmem:[%s6881_s26 + $0x420] sm:$0xff]  }
  0xdd   : > { %5467 = vmatpush3.bf16.msra.mxu0 %v6155_v34  ;;  %v339_v34 = vld [vmem:[%s6930_s13 + $0x18] sm:$0xff] }
  0xde   : > { %5489 = vmatpush3.bf16.msra.mxu1 %v6156_v35  ;;  %5468 = vmatprep.subr.bf16.mxu0 %v6157_v36  ;;  %v6209_v35 = vld [vmem:[%s6881_s26 + $0x3b0] sm:$0xff]   ;;  %v419_v36 = vrot.slane %v339_v34, %v6935_v43 }
  0xdf   : > { %5490 = vmatprep.subr.bf16.mxu1 %v6158_v37  ;;  %v412_v37 = vcombine.high %v339_v34, %v339_v34  ;;  %v6254_v34 = vld [vmem:[%s6881_s26 + $0x508] sm:$0xff]  }
  0xe1   : > { %5469 = vmatpush3.bf16.msra.mxu0 %v6159_v38  ;;  %v6210_v38 = vld [vmem:[%s6881_s26 + $0x378] sm:$0xff]  }
  0xe2   : > { %5491 = vmatpush3.bf16.msra.mxu1 %v6160_v39  ;;  %5470 = vmatprep.subr.bf16.mxu0 %v6161_v40  ;;  %v6211_v39 = vld [vmem:[%s6881_s26 + $0x3f8] sm:$0xff]   ;;  %v427_v40 = vcombine.high %v419_v36, %v419_v36 }
  0xe3   : > { %5492 = vmatprep.subr.bf16.mxu1 %v6162_v41  ;;  %v426_v41 = vrot.slane %v412_v37, %v6935_v43  ;;  %v6257_v37 = vld [vmem:[%s6881_s26 + $0x5d0] sm:$0xff]  }
  0xe5   : > { %5471 = vmatpush3.bf16.msra.mxu0 %v6163_v42  ;;  %v6212_v42 = vld [vmem:[%s6881_s26 + $0x338] sm:$0xff]  }
  0xe6   : > { %5493 = vmatpush3.bf16.msra.mxu1 %v6164_v44  ;;  %5472 = vmatprep.subr.bf16.mxu0 %v6165_v45  ;;  %v6213_v44 = vld [vmem:[%s6881_s26 + $0x3b8] sm:$0xff]   ;;  %v626_v45 = vpack.c.bf16 %v427_v40, %v427_v40 }
  0xe7   : > { %5494 = vmatprep.subr.bf16.mxu1 %v6166_v46  ;;  %v428_v46 = vcombine.high %v426_v41, %v426_v41  ;;  %v6260_v40 = vld [vmem:[%s6881_s26 + $0x558] sm:$0xff]  }
  0xe9   : > { %5473 = vmatpush3.bf16.msra.mxu0 %v6167_v47  ;;  %v6215_v47 = vld [vmem:[%s6881_s26 + $0x440] sm:$0xff]  }
  0xea   : > { %5495 = vmatpush3.bf16.msra.mxu1 %v6168_v48  ;;  %5474 = vmatprep.subr.bf16.mxu0 %v6169_v49  ;;  %v628_v48 = vpack.c.bf16 %v428_v46, %v428_v46  ;;  %v6216_v49 = vld [vmem:[%s6881_s26 + $0x4c0] sm:$0xff]  }
  0xeb   : > { %5496 = vmatprep.subr.bf16.mxu1 %v6170_v50  ;;  %v6217_v50 = vld [vmem:[%s6881_s26 + $0x400] sm:$0xff]  }
  0xec   : > { %v6265_v46 = vld [vmem:[%s6881_s26 + $0x5e0] sm:$0xff]  }
  0xed   : > { %5475 = vmatpush3.bf16.msra.mxu0 %v6171_v51  ;;  %v625_v51 = vpack.c.bf16 %v419_v36, %v419_v36  ;;  %v6256_v36 = vld [vmem:[%s6881_s26 + $0x550] sm:$0xff]  }
  0xee   : > { %5497 = vmatpush3.bf16.msra.mxu1 %v6172_v52  ;;  %5476 = vmatprep.subr.bf16.mxu0 %v6173_v53  ;;  %v627_v52 = vpack.c.bf16 %v426_v41, %v426_v41  ;;  %v6218_v53 = vld [vmem:[%s6881_s26 + $0x480] sm:$0xff]   ;;  %v6261_v41 = vld [vmem:[%s6881_s26 + $0x5d8] sm:$0xff]  }
  0xef   : > { %5498 = vmatprep.subr.bf16.mxu1 %v6174_v54  ;;  %v6219_v54 = vld [vmem:[%s6881_s26 + $0x448] sm:$0xff]  }
  0xf1   : > { %5477 = vmatpush3.bf16.msra.mxu0 %v6175_v56  ;;  %v6221_v56 = vld [vmem:[%s6881_s26 + $0x408] sm:$0xff]  }
  0xf2   : > { %5499 = vmatpush3.bf16.msra.mxu1 %v6176_v59  ;;  %5478 = vmatprep.subr.bf16.mxu0 %v6177_v60  ;;  %v6224_v59 = vld [vmem:[%s6881_s26 + $0x4d0] sm:$0xff]  }
  0xf3   : > { %5500 = vmatprep.subr.bf16.mxu1 %v6178_v63  ;;  %v6225_v60 = vld [vmem:[%s6881_s26 + $0x410] sm:$0xff]   ;;  %v6228_v63 = vld [vmem:[%s6881_s26 + $0x4d8] sm:$0xff]  }
  0xf5   : > { %5479 = vmatpush3.bf16.msra.mxu0 %v6179_v0  ;;  %v6229_v0 = vld [vmem:[%s6881_s26 + $0x418] sm:$0xff]  }
  0xf6   : > { %5501 = vmatpush3.bf16.msra.mxu1 %v6180_v3  ;;  %5508 = vmatprep.subr.bf16.mxu0 %v6182_v5  ;;  %v6232_v3 = vld [vmem:[%s6881_s26 + $0x4e0] sm:$0xff]  }
  0xf7   : > { %5530 = vmatprep.subr.bf16.mxu1 %v6183_v6  ;;  %v6234_v5 = vld [vmem:[%s6881_s26 + $0x4a0] sm:$0xff]   ;;  %v6235_v6 = vld [vmem:[%s6881_s26 + $0x468] sm:$0xff]  }
  0xf8   : > { %3926 = vmatmul.mubr.bf16.vlgmr.msra.gmra.mrb[8].mxu0 %v621_v8  ;;  %v6237_v8 = vld [vmem:[%s6881_s26 + $0x428] sm:$0xff]  }
  0xf9   : > { %3966 = vmatmul.mubr.bf16.vlgmr.msra.gmra.mrb[8].mxu1 %v623_v9  ;;  %5509 = vmatpush3.bf16.msra.mxu0 %v6184_v7  ;;  %v6236_v7 = vld [vmem:[%s6881_s26 + $0x4e8] sm:$0xff]  }
  0xfa   : > { %5531 = vmatpush3.bf16.msra.mxu1 %v6185_v10  ;;  %5510 = vmatprep.subr.bf16.mxu0 %v6186_v11  ;;  %v6238_v9 = vld [vmem:[%s6881_s26 + $0x4a8] sm:$0xff]   ;;  %v6239_v10 = vld [vmem:[%s6881_s26 + $0x470] sm:$0xff]  }
  0xfb   : > { %5532 = vmatprep.subr.bf16.mxu1 %v6187_v12  ;;  %4005 = vmatprep.mubr.bf16.mxu0 %v626_v45  ;;  %v6240_v11 = vld [vmem:[%s6881_s26 + $0x4f0] sm:$0xff]   ;;  %v6264_v45 = vld [vmem:[%s6881_s26 + $0x560] sm:$0xff]  }
  0xfc   : > { %4045 = vmatprep.mubr.bf16.mxu1 %v628_v48  ;;  %v6241_v12 = vld [vmem:[%s6881_s26 + $0x430] sm:$0xff]   ;;  %v6267_v48 = vld [vmem:[%s6881_s26 + $0x5a0] sm:$0xff]  }
  0xfd   : > { %5511 = vmatpush3.bf16.msra.mxu0 %v6188_v13  ;;  %v340_v13 = vld [vmem:[%s6930_s13 + $0x20] sm:$0xff] }
  0xfe   : > { %5533 = vmatpush3.bf16.msra.mxu1 %v6189_v14  ;;  %5512 = vmatprep.subr.bf16.mxu0 %v6190_v15  ;;  %v6242_v14 = vld [vmem:[%s6881_s26 + $0x4b0] sm:$0xff]   ;;  %v436_v15 = vrot.slane %v340_v13, %v6935_v43 }
  0xff   : > { %5534 = vmatprep.subr.bf16.mxu1 %v6191_v16  ;;  %v429_v16 = vcombine.high %v340_v13, %v340_v13  ;;  %v6287_v13 = vld [vmem:[%s6881_s26 + $0x608] sm:$0xff]  }
 0x101   : > { %5513 = vmatpush3.bf16.msra.mxu0 %v6192_v17  ;;  %v6243_v17 = vld [vmem:[%s6881_s26 + $0x478] sm:$0xff]  }
 0x102   : > { %5535 = vmatpush3.bf16.msra.mxu1 %v6193_v18  ;;  %5514 = vmatprep.subr.bf16.mxu0 %v6194_v19  ;;  %v6244_v18 = vld [vmem:[%s6881_s26 + $0x4f8] sm:$0xff]   ;;  %v444_v19 = vcombine.high %v436_v15, %v436_v15 }
 0x103   : > { %5536 = vmatprep.subr.bf16.mxu1 %v6195_v20  ;;  %v443_v20 = vrot.slane %v429_v16, %v6935_v43  ;;  %v6290_v16 = vld [vmem:[%s6881_s26 + $0x6d0] sm:$0xff]  }
 0x105   : > { %5515 = vmatpush3.bf16.msra.mxu0 %v6196_v21  ;;  %v6245_v21 = vld [vmem:[%s6881_s26 + $0x438] sm:$0xff]  }
 0x106   : > { %5537 = vmatpush3.bf16.msra.mxu1 %v6197_v22  ;;  %5516 = vmatprep.subr.bf16.mxu0 %v6198_v23  ;;  %v6246_v22 = vld [vmem:[%s6881_s26 + $0x4b8] sm:$0xff]   ;;  %v630_v23 = vpack.c.bf16 %v444_v19, %v444_v19 }
 0x107   : > { %5538 = vmatprep.subr.bf16.mxu1 %v6199_v24  ;;  %v445_v24 = vcombine.high %v443_v20, %v443_v20  ;;  %v6293_v19 = vld [vmem:[%s6881_s26 + $0x658] sm:$0xff]  }
 0x109   : > { %5517 = vmatpush3.bf16.msra.mxu0 %v6200_v25  ;;  %v6248_v25 = vld [vmem:[%s6881_s26 + $0x540] sm:$0xff]  }
 0x10a   : > { %5539 = vmatpush3.bf16.msra.mxu1 %v6201_v26  ;;  %5518 = vmatprep.subr.bf16.mxu0 %v6202_v27  ;;  %v632_v26 = vpack.c.bf16 %v445_v24, %v445_v24  ;;  %v6249_v27 = vld [vmem:[%s6881_s26 + $0x5c0] sm:$0xff]  }
 0x10b   : > { %5540 = vmatprep.subr.bf16.mxu1 %v6203_v28  ;;  %v6250_v28 = vld [vmem:[%s6881_s26 + $0x500] sm:$0xff]  }
 0x10c   : > { %v6298_v24 = vld [vmem:[%s6881_s26 + $0x6e0] sm:$0xff]  }
 0x10d   : > { %5519 = vmatpush3.bf16.msra.mxu0 %v6204_v29  ;;  %v629_v29 = vpack.c.bf16 %v436_v15, %v436_v15  ;;  %v6289_v15 = vld [vmem:[%s6881_s26 + $0x650] sm:$0xff]  }
 0x10e   : > { %5541 = vmatpush3.bf16.msra.mxu1 %v6205_v30  ;;  %5520 = vmatprep.subr.bf16.mxu0 %v6206_v31  ;;  %v631_v30 = vpack.c.bf16 %v443_v20, %v443_v20  ;;  %v6251_v31 = vld [vmem:[%s6881_s26 + $0x580] sm:$0xff]   ;;  %v6294_v20 = vld [vmem:[%s6881_s26 + $0x6d8] sm:$0xff]  }
 0x10f   : > { %5542 = vmatprep.subr.bf16.mxu1 %v6207_v32  ;;  %v6252_v32 = vld [vmem:[%s6881_s26 + $0x548] sm:$0xff]  }
 0x111   : > { %5521 = vmatpush3.bf16.msra.mxu0 %v6208_v33  ;;  %v6253_v33 = vld [vmem:[%s6881_s26 + $0x5c8] sm:$0xff]  }
 0x112   : > { %5543 = vmatpush3.bf16.msra.mxu1 %v6209_v35  ;;  %5522 = vmatprep.subr.bf16.mxu0 %v6210_v38  ;;  %v6255_v35 = vld [vmem:[%s6881_s26 + $0x588] sm:$0xff]   ;;  %v6258_v38 = vld [vmem:[%s6881_s26 + $0x510] sm:$0xff]  }
 0x113   : > { %5544 = vmatprep.subr.bf16.mxu1 %v6211_v39  ;;  %v6259_v39 = vld [vmem:[%s6881_s26 + $0x590] sm:$0xff]  }
 0x115   : > { %5523 = vmatpush3.bf16.msra.mxu0 %v6212_v42  ;;  %v6262_v42 = vld [vmem:[%s6881_s26 + $0x518] sm:$0xff]  }
 0x116   : > { %5545 = vmatpush3.bf16.msra.mxu1 %v6213_v44  ;;  %5552 = vmatprep.subr.bf16.mxu0 %v6215_v47  ;;  %v6263_v44 = vld [vmem:[%s6881_s26 + $0x598] sm:$0xff]   ;;  %v6266_v47 = vld [vmem:[%s6881_s26 + $0x520] sm:$0xff]  }
 0x117   : > { %5574 = vmatprep.subr.bf16.mxu1 %v6216_v49  ;;  %v6268_v49 = vld [vmem:[%s6881_s26 + $0x568] sm:$0xff]  }
 0x118   : > { %4006 = vmatmul.mubr.bf16.vlgmr.msra.gmra.mrb[12].mxu0 %v625_v51  ;;  %v6270_v51 = vld [vmem:[%s6881_s26 + $0x528] sm:$0xff]  }
 0x119   : > { %4046 = vmatmul.mubr.bf16.vlgmr.msra.gmra.mrb[12].mxu1 %v627_v52  ;;  %5553 = vmatpush3.bf16.msra.mxu0 %v6217_v50  ;;  %v6269_v50 = vld [vmem:[%s6881_s26 + $0x5e8] sm:$0xff]  }
 0x11a   : > { %5575 = vmatpush3.bf16.msra.mxu1 %v6218_v53  ;;  %5554 = vmatprep.subr.bf16.mxu0 %v6219_v54  ;;  %v6271_v52 = vld [vmem:[%s6881_s26 + $0x5a8] sm:$0xff]   ;;  %v6272_v53 = vld [vmem:[%s6881_s26 + $0x570] sm:$0xff]  }
 0x11b   : > { %5576 = vmatprep.subr.bf16.mxu1 %v6220_v55  ;;  %4085 = vmatprep.mubr.bf16.mxu0 %v630_v23  ;;  %v6273_v54 = vld [vmem:[%s6881_s26 + $0x5f0] sm:$0xff]   ;;  %v6297_v23 = vld [vmem:[%s6881_s26 + $0x660] sm:$0xff]  }
 0x11c   : > { %4125 = vmatprep.mubr.bf16.mxu1 %v632_v26  ;;  %v6274_v55 = vld [vmem:[%s6881_s26 + $0x530] sm:$0xff]   ;;  %v6300_v26 = vld [vmem:[%s6881_s26 + $0x6a0] sm:$0xff]  }
 0x11d   : > { %5555 = vmatpush3.bf16.msra.mxu0 %v6221_v56  ;;  %v341_v56 = vld [vmem:[%s6930_s13 + $0x28] sm:$0xff] }
 0x11e   : > { %5577 = vmatpush3.bf16.msra.mxu1 %v6222_v57  ;;  %5556 = vmatprep.subr.bf16.mxu0 %v6223_v58  ;;  %v6275_v57 = vld [vmem:[%s6881_s26 + $0x5b0] sm:$0xff]   ;;  %v453_v58 = vrot.slane %v341_v56, %v6935_v43 }
 0x11f   : > { %5578 = vmatprep.subr.bf16.mxu1 %v6224_v59  ;;  %v446_v59 = vcombine.high %v341_v56, %v341_v56  ;;  %v6320_v56 = vld [vmem:[%s6881_s26 + $0x708] sm:$0xff]  }
 0x121   : > { %5557 = vmatpush3.bf16.msra.mxu0 %v6225_v60  ;;  %v6276_v60 = vld [vmem:[%s6881_s26 + $0x578] sm:$0xff]  }
 0x122   : > { %5579 = vmatpush3.bf16.msra.mxu1 %v6226_v61  ;;  %5558 = vmatprep.subr.bf16.mxu0 %v6227_v62  ;;  %v6277_v61 = vld [vmem:[%s6881_s26 + $0x5f8] sm:$0xff]   ;;  %v461_v62 = vcombine.high %v453_v58, %v453_v58 }
 0x123   : > { %5580 = vmatprep.subr.bf16.mxu1 %v6228_v63  ;;  %v460_v63 = vrot.slane %v446_v59, %v6935_v43  ;;  %v6323_v59 = vld [vmem:[%s6881_s26 + $0x7d0] sm:$0xff]  }
 0x125   : > { %5559 = vmatpush3.bf16.msra.mxu0 %v6229_v0  ;;  %v6278_v0 = vld [vmem:[%s6881_s26 + $0x538] sm:$0xff]  }
 0x126   : > { %5581 = vmatpush3.bf16.msra.mxu1 %v6230_v1  ;;  %5560 = vmatprep.subr.bf16.mxu0 %v6231_v2  ;;  %v6279_v1 = vld [vmem:[%s6881_s26 + $0x5b8] sm:$0xff]   ;;  %v634_v2 = vpack.c.bf16 %v461_v62, %v461_v62 }
 0x127   : > { %5582 = vmatprep.subr.bf16.mxu1 %v6232_v3  ;;  %v462_v3 = vcombine.high %v460_v63, %v460_v63  ;;  %v6326_v62 = vld [vmem:[%s6881_s26 + $0x758] sm:$0xff]  }
 0x129   : > { %5561 = vmatpush3.bf16.msra.mxu0 %v6233_v4  ;;  %v6281_v4 = vld [vmem:[%s6881_s26 + $0x640] sm:$0xff]  }
 0x12a   : > { %5583 = vmatpush3.bf16.msra.mxu1 %v6234_v5  ;;  %5562 = vmatprep.subr.bf16.mxu0 %v6235_v6  ;;  %v636_v5 = vpack.c.bf16 %v462_v3, %v462_v3  ;;  %v6282_v6 = vld [vmem:[%s6881_s26 + $0x6c0] sm:$0xff]  }
 0x12b   : > { %5584 = vmatprep.subr.bf16.mxu1 %v6236_v7  ;;  %v6283_v7 = vld [vmem:[%s6881_s26 + $0x600] sm:$0xff]  }
 0x12c   : > { %v6331_v3 = vld [vmem:[%s6881_s26 + $0x7e0] sm:$0xff]  }
 0x12d   : > { %5563 = vmatpush3.bf16.msra.mxu0 %v6237_v8  ;;  %v633_v8 = vpack.c.bf16 %v453_v58, %v453_v58  ;;  %v6322_v58 = vld [vmem:[%s6881_s26 + $0x750] sm:$0xff]  }
 0x12e   : > { %5585 = vmatpush3.bf16.msra.mxu1 %v6238_v9  ;;  %5564 = vmatprep.subr.bf16.mxu0 %v6239_v10  ;;  %v635_v9 = vpack.c.bf16 %v460_v63, %v460_v63  ;;  %v6284_v10 = vld [vmem:[%s6881_s26 + $0x680] sm:$0xff]   ;;  %v6327_v63 = vld [vmem:[%s6881_s26 + $0x7d8] sm:$0xff]  }
 0x12f   : > { %5586 = vmatprep.subr.bf16.mxu1 %v6240_v11  ;;  %v6285_v11 = vld [vmem:[%s6881_s26 + $0x648] sm:$0xff]  }
 0x131   : > { %5565 = vmatpush3.bf16.msra.mxu0 %v6241_v12  ;;  %v6286_v12 = vld [vmem:[%s6881_s26 + $0x6c8] sm:$0xff]  }
 0x132   : > { %5587 = vmatpush3.bf16.msra.mxu1 %v6242_v14  ;;  %5566 = vmatprep.subr.bf16.mxu0 %v6243_v17  ;;  %v6288_v14 = vld [vmem:[%s6881_s26 + $0x688] sm:$0xff]   ;;  %v6291_v17 = vld [vmem:[%s6881_s26 + $0x610] sm:$0xff]  }
 0x133   : > { %5588 = vmatprep.subr.bf16.mxu1 %v6244_v18  ;;  %v6292_v18 = vld [vmem:[%s6881_s26 + $0x690] sm:$0xff]  }
 0x135   : > { %5567 = vmatpush3.bf16.msra.mxu0 %v6245_v21  ;;  %v6295_v21 = vld [vmem:[%s6881_s26 + $0x618] sm:$0xff]  }
 0x136   : > { %5589 = vmatpush3.bf16.msra.mxu1 %v6246_v22  ;;  %5596 = vmatprep.subr.bf16.mxu0 %v6248_v25  ;;  %v6296_v22 = vld [vmem:[%s6881_s26 + $0x698] sm:$0xff]   ;;  %v6299_v25 = vld [vmem:[%s6881_s26 + $0x620] sm:$0xff]  }
 0x137   : > { %5618 = vmatprep.subr.bf16.mxu1 %v6249_v27  ;;  %v6301_v27 = vld [vmem:[%s6881_s26 + $0x668] sm:$0xff]  }
 0x138   : > { %4086 = vmatmul.mubr.bf16.vlgmr.msra.gmra.mrb[16].mxu0 %v629_v29  ;;  %v6303_v29 = vld [vmem:[%s6881_s26 + $0x628] sm:$0xff]  }
 0x139   : > { %4126 = vmatmul.mubr.bf16.vlgmr.msra.gmra.mrb[16].mxu1 %v631_v30  ;;  %5597 = vmatpush3.bf16.msra.mxu0 %v6250_v28  ;;  %v6302_v28 = vld [vmem:[%s6881_s26 + $0x6e8] sm:$0xff]  }
 0x13a   : > { %5619 = vmatpush3.bf16.msra.mxu1 %v6251_v31  ;;  %5598 = vmatprep.subr.bf16.mxu0 %v6252_v32  ;;  %v6304_v30 = vld [vmem:[%s6881_s26 + $0x6a8] sm:$0xff]   ;;  %v6305_v31 = vld [vmem:[%s6881_s26 + $0x670] sm:$0xff]  }
 0x13b   : > { %5620 = vmatprep.subr.bf16.mxu1 %v6253_v33  ;;  %4165 = vmatprep.mubr.bf16.mxu0 %v634_v2  ;;  %v6306_v32 = vld [vmem:[%s6881_s26 + $0x6f0] sm:$0xff]   ;;  %v6330_v2 = vld [vmem:[%s6881_s26 + $0x760] sm:$0xff]  }
 0x13c   : > { %4205 = vmatprep.mubr.bf16.mxu1 %v636_v5  ;;  %v6307_v33 = vld [vmem:[%s6881_s26 + $0x630] sm:$0xff]   ;;  %v6333_v5 = vld [vmem:[%s6881_s26 + $0x7a0] sm:$0xff]  }
 0x13d   : > { %5599 = vmatpush3.bf16.msra.mxu0 %v6254_v34  ;;  %v6308_v34 = vld [vmem:[%s6881_s26 + $0x6b0] sm:$0xff]  }
 0x13e   : > { %5621 = vmatpush3.bf16.msra.mxu1 %v6255_v35  ;;  %5600 = vmatprep.subr.bf16.mxu0 %v6256_v36  ;;  %v342_v35 = vld [vmem:[%s6930_s13 + $0x30] sm:$0xff]  ;;  %v6309_v36 = vld [vmem:[%s6881_s26 + $0x678] sm:$0xff]  }
 0x13f   : > { %5622 = vmatprep.subr.bf16.mxu1 %v6257_v37  ;;  %v470_v37 = vrot.slane %v342_v35, %v6935_v43 }
 0x141   : > { %5601 = vmatpush3.bf16.msra.mxu0 %v6258_v38  ;;  %v463_v38 = vcombine.high %v342_v35, %v342_v35  ;;  %v6347_v35 = vld [vmem:[%s6881_s26 + $0x840] sm:$0xff]  }
 0x142   : > { %5623 = vmatpush3.bf16.msra.mxu1 %v6259_v39  ;;  %5602 = vmatprep.subr.bf16.mxu0 %v6260_v40  ;;  %v6310_v39 = vld [vmem:[%s6881_s26 + $0x6f8] sm:$0xff]  }
 0x143   : > { %5624 = vmatprep.subr.bf16.mxu1 %v6261_v41  ;;  %v6311_v40 = vld [vmem:[%s6881_s26 + $0x638] sm:$0xff]   ;;  %v478_v41 = vcombine.high %v470_v37, %v470_v37 }
 0x145   : > { %5603 = vmatpush3.bf16.msra.mxu0 %v6262_v42  ;;  %v477_v42 = vrot.slane %v463_v38, %v6935_v43  ;;  %v6349_v38 = vld [vmem:[%s6881_s26 + $0x800] sm:$0xff]  }
 0x146   : > { %5625 = vmatpush3.bf16.msra.mxu1 %v6263_v44  ;;  %5604 = vmatprep.subr.bf16.mxu0 %v6264_v45  ;;  %v6312_v44 = vld [vmem:[%s6881_s26 + $0x6b8] sm:$0xff]   ;;  %v638_v45 = vpack.c.bf16 %v478_v41, %v478_v41 }
 0x147   : > { %5626 = vmatprep.subr.bf16.mxu1 %v6265_v46  ;;  %v479_v46 = vcombine.high %v477_v42, %v477_v42 }
 0x149   : > { %5605 = vmatpush3.bf16.msra.mxu0 %v6266_v47  ;;  %v6314_v47 = vld [vmem:[%s6881_s26 + $0x740] sm:$0xff]  }
 0x14a   : > { %5627 = vmatpush3.bf16.msra.mxu1 %v6267_v48  ;;  %5606 = vmatprep.subr.bf16.mxu0 %v6268_v49  ;;  %v6315_v48 = vld [vmem:[%s6881_s26 + $0x7c0] sm:$0xff]   ;;  %v640_v49 = vpack.c.bf16 %v479_v46, %v479_v46  ;;  %v6353_v46 = vld [vmem:[%s6881_s26 + $0x808] sm:$0xff]  }
 0x14b   : > { %5628 = vmatprep.subr.bf16.mxu1 %v6269_v50  ;;  %v6316_v50 = vld [vmem:[%s6881_s26 + $0x700] sm:$0xff]  }
 0x14d   : > { %5607 = vmatpush3.bf16.msra.mxu0 %v6270_v51  ;;  %v637_v51 = vpack.c.bf16 %v470_v37, %v470_v37  ;;  %v6348_v37 = vld [vmem:[%s6881_s26 + $0x8c0] sm:$0xff]  }
 0x14e   : > { %5629 = vmatpush3.bf16.msra.mxu1 %v6271_v52  ;;  %5608 = vmatprep.subr.bf16.mxu0 %v6272_v53  ;;  %v639_v52 = vpack.c.bf16 %v477_v42, %v477_v42  ;;  %v6317_v53 = vld [vmem:[%s6881_s26 + $0x780] sm:$0xff]  }
 0x14f   : > { %5630 = vmatprep.subr.bf16.mxu1 %v6273_v54  ;;  %v6318_v54 = vld [vmem:[%s6881_s26 + $0x748] sm:$0xff]   ;;  %v6350_v42 = vld [vmem:[%s6881_s26 + $0x880] sm:$0xff]  }
 0x151   : > { %5609 = vmatpush3.bf16.msra.mxu0 %v6274_v55  ;;  %v6319_v55 = vld [vmem:[%s6881_s26 + $0x7c8] sm:$0xff]  }
 0x152   : > { %5631 = vmatpush3.bf16.msra.mxu1 %v6275_v57  ;;  %5610 = vmatprep.subr.bf16.mxu0 %v6276_v60  ;;  %v6321_v57 = vld [vmem:[%s6881_s26 + $0x788] sm:$0xff]   ;;  %v6324_v60 = vld [vmem:[%s6881_s26 + $0x710] sm:$0xff]  }
 0x153   : > { %5632 = vmatprep.subr.bf16.mxu1 %v6277_v61  ;;  %v6325_v61 = vld [vmem:[%s6881_s26 + $0x790] sm:$0xff]  }
 0x155   : > { %5611 = vmatpush3.bf16.msra.mxu0 %v6278_v0  ;;  %v6328_v0 = vld [vmem:[%s6881_s26 + $0x718] sm:$0xff]  }
 0x156   : > { %5633 = vmatpush3.bf16.msra.mxu1 %v6279_v1  ;;  %5640 = vmatprep.subr.bf16.mxu0 %v6281_v4  ;;  %v6329_v1 = vld [vmem:[%s6881_s26 + $0x798] sm:$0xff]   ;;  %v6332_v4 = vld [vmem:[%s6881_s26 + $0x720] sm:$0xff]  }
 0x157   : > { %5662 = vmatprep.subr.bf16.mxu1 %v6282_v6  ;;  %v6334_v6 = vld [vmem:[%s6881_s26 + $0x768] sm:$0xff]  }
 0x158   : > { %4166 = vmatmul.mubr.bf16.vlgmr.msra.gmra.mrb[20].mxu0 %v633_v8  ;;  %v6336_v8 = vld [vmem:[%s6881_s26 + $0x728] sm:$0xff]  }
 0x159   : > { %4206 = vmatmul.mubr.bf16.vlgmr.msra.gmra.mrb[20].mxu1 %v635_v9  ;;  %5641 = vmatpush3.bf16.msra.mxu0 %v6283_v7  ;;  %v6335_v7 = vld [vmem:[%s6881_s26 + $0x7e8] sm:$0xff]  }
 0x15a   : > { %5663 = vmatpush3.bf16.msra.mxu1 %v6284_v10  ;;  %5642 = vmatprep.subr.bf16.mxu0 %v6285_v11  ;;  %v6337_v9 = vld [vmem:[%s6881_s26 + $0x7a8] sm:$0xff]   ;;  %v6338_v10 = vld [vmem:[%s6881_s26 + $0x770] sm:$0xff]  }
 0x15b   : > { %5664 = vmatprep.subr.bf16.mxu1 %v6286_v12  ;;  %4245 = vmatprep.mubr.bf16.mxu0 %v638_v45  ;;  %v6339_v11 = vld [vmem:[%s6881_s26 + $0x7f0] sm:$0xff]   ;;  %v6352_v45 = vld [vmem:[%s6881_s26 + $0x8c8] sm:$0xff]  }
 0x15c   : > { %4285 = vmatprep.mubr.bf16.mxu1 %v640_v49  ;;  %v6356_v49 = vld [vmem:[%s6881_s26 + $0x8d0] sm:$0xff]  }
 0x15d   : > { %5643 = vmatpush3.bf16.msra.mxu0 %v6287_v13 }
 0x15e   : > { %5665 = vmatpush3.bf16.msra.mxu1 %v6288_v14  ;;  %5644 = vmatprep.subr.bf16.mxu0 %v6289_v15  ;;  %v6340_v14 = vld [vmem:[%s6881_s26 + $0x730] sm:$0xff]  }
 0x15f   : > { %5666 = vmatprep.subr.bf16.mxu1 %v6290_v16  ;;  %v6341_v15 = vld [vmem:[%s6881_s26 + $0x7b0] sm:$0xff]  }
 0x161   : > { %5645 = vmatpush3.bf16.msra.mxu0 %v6291_v17 }
 0x162   : > { %5667 = vmatpush3.bf16.msra.mxu1 %v6292_v18  ;;  %5646 = vmatprep.subr.bf16.mxu0 %v6293_v19  ;;  %v6342_v18 = vld [vmem:[%s6881_s26 + $0x778] sm:$0xff]  }
 0x163   : > { %5668 = vmatprep.subr.bf16.mxu1 %v6294_v20  ;;  %v6343_v19 = vld [vmem:[%s6881_s26 + $0x7f8] sm:$0xff]  }
 0x164   : > { %v343_v20 = vld [vmem:[%s6930_s13 + $0x38] sm:$0xff] }
 0x165   : > { %5647 = vmatpush3.bf16.msra.mxu0 %v6295_v21 }
 0x166   : > { %5669 = vmatpush3.bf16.msra.mxu1 %v6296_v22  ;;  %5648 = vmatprep.subr.bf16.mxu0 %v6297_v23 }
 0x167   : > { %5670 = vmatprep.subr.bf16.mxu1 %v6298_v24 }
 0x169   : > { %5649 = vmatpush3.bf16.msra.mxu0 %v6299_v25  ;;  %v487_v25 = vrot.slane %v343_v20, %v6935_v43 }
 0x16a   : > { %5671 = vmatpush3.bf16.msra.mxu1 %v6300_v26  ;;  %5650 = vmatprep.subr.bf16.mxu0 %v6301_v27 }
 0x16b   : > { %5672 = vmatprep.subr.bf16.mxu1 %v6302_v28  ;;  %v480_v28 = vcombine.high %v343_v20, %v343_v20  ;;  %v6377_v20 = vld [vmem:[%s6881_s26 + $0x838] sm:$0xff]  }
 0x16d   : > { %5651 = vmatpush3.bf16.msra.mxu0 %v6303_v29 }
 0x16e   : > { %5673 = vmatpush3.bf16.msra.mxu1 %v6304_v30  ;;  %5652 = vmatprep.subr.bf16.mxu0 %v6305_v31  ;;  %v6344_v30 = vld [vmem:[%s6881_s26 + $0x738] sm:$0xff]   ;;  %v495_v31 = vcombine.high %v487_v25, %v487_v25 }
 0x16f   : > { %5674 = vmatprep.subr.bf16.mxu1 %v6306_v32  ;;  %v6345_v32 = vld [vmem:[%s6881_s26 + $0x7b8] sm:$0xff]  }
 0x171   : > { %5653 = vmatpush3.bf16.msra.mxu0 %v6307_v33  ;;  %v494_v33 = vrot.slane %v480_v28, %v6935_v43  ;;  %v6381_v28 = vld [vmem:[%s6881_s26 + $0x9c0] sm:$0xff]  }
 0x172   : > { %5675 = vmatpush3.bf16.msra.mxu1 %v6308_v34  ;;  %5654 = vmatprep.subr.bf16.mxu0 %v6309_v36  ;;  %v642_v34 = vpack.c.bf16 %v495_v31, %v495_v31 }
 0x173   : > { %5676 = vmatprep.subr.bf16.mxu1 %v6310_v39  ;;  %v496_v36 = vcombine.high %v494_v33, %v494_v33  ;;  %v643_v41 = vpack.c.bf16 %v494_v33, %v494_v33  ;;  %v6383_v33 = vld [vmem:[%s6881_s26 + $0x980] sm:$0xff]  }
 0x175   : > { %5655 = vmatpush3.bf16.msra.mxu0 %v6311_v40  ;;  %v644_v39 = vpack.c.bf16 %v496_v36, %v496_v36  ;;  %v641_v40 = vpack.c.bf16 %v487_v25, %v487_v25  ;;  %v6380_v25 = vld [vmem:[%s6881_s26 + $0x940] sm:$0xff]   ;;  %v6386_v36 = vld [vmem:[%s6881_s26 + $0x908] sm:$0xff]  }
 0x176   : > { %5677 = vmatpush3.bf16.msra.mxu1 %v6312_v44  ;;  %5684 = vmatprep.subr.bf16.mxu0 %v6314_v47  ;;  %v6351_v44 = vld [vmem:[%s6881_s26 + $0x848] sm:$0xff]  }
 0x177   : > { %5706 = vmatprep.subr.bf16.mxu1 %v6315_v48  ;;  %v6354_v47 = vld [vmem:[%s6881_s26 + $0x888] sm:$0xff]   ;;  %v6355_v48 = vld [vmem:[%s6881_s26 + $0x850] sm:$0xff]  }
 0x178   : > { %4246 = vmatmul.mubr.bf16.vlgmr.msra.gmra.mrb[24].mxu0 %v637_v51  ;;  %v6358_v51 = vld [vmem:[%s6881_s26 + $0x890] sm:$0xff]  }
 0x179   : > { %4286 = vmatmul.mubr.bf16.vlgmr.msra.gmra.mrb[24].mxu1 %v639_v52  ;;  %5685 = vmatpush3.bf16.msra.mxu0 %v6316_v50  ;;  %v6357_v50 = vld [vmem:[%s6881_s26 + $0x810] sm:$0xff]   ;;  %v6359_v52 = vld [vmem:[%s6881_s26 + $0x858] sm:$0xff]  }
 0x17a   : > { %5707 = vmatpush3.bf16.msra.mxu1 %v6317_v53  ;;  %5686 = vmatprep.subr.bf16.mxu0 %v6318_v54  ;;  %v6360_v53 = vld [vmem:[%s6881_s26 + $0x8d8] sm:$0xff]  }
 0x17b   : > { %5708 = vmatprep.subr.bf16.mxu1 %v6319_v55  ;;  %4325 = vmatprep.mubr.bf16.mxu0 %v642_v34  ;;  %v6361_v54 = vld [vmem:[%s6881_s26 + $0x818] sm:$0xff]   ;;  %v6384_v34 = vld [vmem:[%s6881_s26 + $0x948] sm:$0xff]  }
 0x17c   : > { %4365 = vmatprep.mubr.bf16.mxu1 %v644_v39  ;;  %v6362_v55 = vld [vmem:[%s6881_s26 + $0x898] sm:$0xff]   ;;  %v6389_v39 = vld [vmem:[%s6881_s26 + $0x9d0] sm:$0xff]  }
 0x17d   : > { %5687 = vmatpush3.bf16.msra.mxu0 %v6320_v56  ;;  %v6363_v56 = vld [vmem:[%s6881_s26 + $0x860] sm:$0xff]  }
 0x17e   : > { %5709 = vmatpush3.bf16.msra.mxu1 %v6321_v57  ;;  %5688 = vmatprep.subr.bf16.mxu0 %v6322_v58  ;;  %v6364_v57 = vld [vmem:[%s6881_s26 + $0x8e0] sm:$0xff]  }
 0x17f   : > { %5710 = vmatprep.subr.bf16.mxu1 %v6323_v59  ;;  %v6365_v58 = vld [vmem:[%s6881_s26 + $0x820] sm:$0xff]  }
 0x180   : > { %v6366_v59 = vld [vmem:[%s6881_s26 + $0x8a0] sm:$0xff]  }
 0x181   : > { %5689 = vmatpush3.bf16.msra.mxu0 %v6324_v60  ;;  %v6367_v60 = vld [vmem:[%s6881_s26 + $0x868] sm:$0xff]  }
 0x182   : > { %5711 = vmatpush3.bf16.msra.mxu1 %v6325_v61  ;;  %5690 = vmatprep.subr.bf16.mxu0 %v6326_v62  ;;  %v6368_v61 = vld [vmem:[%s6881_s26 + $0x8e8] sm:$0xff]  }
 0x183   : > { %5712 = vmatprep.subr.bf16.mxu1 %v6327_v63  ;;  %v6369_v62 = vld [vmem:[%s6881_s26 + $0x828] sm:$0xff]  }
 0x184   : > { %v6370_v63 = vld [vmem:[%s6881_s26 + $0x8a8] sm:$0xff]  }
 0x185   : > { %5691 = vmatpush3.bf16.msra.mxu0 %v6328_v0  ;;  %v6371_v0 = vld [vmem:[%s6881_s26 + $0x870] sm:$0xff]  }
 0x186   : > { %5713 = vmatpush3.bf16.msra.mxu1 %v6329_v1  ;;  %5692 = vmatprep.subr.bf16.mxu0 %v6330_v2  ;;  %v6372_v1 = vld [vmem:[%s6881_s26 + $0x8f0] sm:$0xff]  }
 0x187   : > { %5714 = vmatprep.subr.bf16.mxu1 %v6331_v3 }
 0x189   : > { %5693 = vmatpush3.bf16.msra.mxu0 %v6332_v4  ;;  %v6373_v4 = vld [vmem:[%s6881_s26 + $0x830] sm:$0xff]  }
 0x18a   : > { %5715 = vmatpush3.bf16.msra.mxu1 %v6333_v5  ;;  %5694 = vmatprep.subr.bf16.mxu0 %v6334_v6  ;;  %v6374_v5 = vld [vmem:[%s6881_s26 + $0x8b0] sm:$0xff]  }
 0x18b   : > { %5716 = vmatprep.subr.bf16.mxu1 %v6335_v7  ;;  %v5392_v12 = vpop.f32.mrb[0].mxu0 }
 0x18c   : > { %v5414_v13 = vpop.f32.mrb[0].mxu1  ;;  %v5393_v16 = vpop.f32.mrb[1].mxu0 }
 0x18d   : > { %v5415_v17 = vpop.f32.mrb[1].mxu1  ;;  %v5394_v21 = vadd.f32 %v5393_v16, %v5392_v12  ;;  %v5395_v23 = vpop.f32.mrb[2].mxu0  ;;  %5695 = vmatpush3.bf16.msra.mxu0 %v6336_v8  ;;  %v6375_v8 = vld [vmem:[%s6881_s26 + $0x878] sm:$0xff]  }
 0x18e   : > { %v5416_v22 = vadd.f32 %v5415_v17, %v5414_v13  ;;  %v5417_v24 = vpop.f32.mrb[2].mxu1  ;;  %5717 = vmatpush3.bf16.msra.mxu1 %v6337_v9  ;;  %v5396_v26 = vpop.f32.mrb[3].mxu0  ;;  %5696 = vmatprep.subr.bf16.mxu0 %v6338_v10  ;;  %v6376_v13 = vld [vmem:[%s6881_s26 + $0x8f8] sm:$0xff]  }
 0x18f   : > { %v5418_v27 = vpop.f32.mrb[3].mxu1  ;;  %5718 = vmatprep.subr.bf16.mxu1 %v6339_v11 }
 0x190   : > { %v7179_v29 = vadd.f32 %v5416_v22, %v5394_v21  ;;  %v6378_v21 = vld [vmem:[%s6881_s26 + $0x8b8] sm:$0xff]  }
 0x191   : > { %5697 = vmatpush3.bf16.msra.mxu0 %v6340_v14  ;;  %v344_v14 = vld [vmem:[%s6930_s13 + $0x40] sm:$0xff] }
 0x192   : > { %5719 = vmatpush3.bf16.msra.mxu1 %v6341_v15  ;;  %5698 = vmatprep.subr.bf16.mxu0 %v6342_v18  ;;  %v504_v17 = vrot.slane %v344_v14, %v6935_v43  ;;  %v497_v18 = vcombine.high %v344_v14, %v344_v14 }
 0x193   : > { %5720 = vmatprep.subr.bf16.mxu1 %v6343_v19 }
 0x194   : > { %v512_v22 = vcombine.high %v504_v17, %v504_v17  ;;  %v511_v23 = vrot.slane %v497_v18, %v6935_v43  ;;  %v645_v31 = vpack.c.bf16 %v504_v17, %v504_v17  ;;  %v6414_v17 = vld [vmem:[%s6881_s26 + $0xac0] sm:$0xff]  }
 0x195   : > { %5699 = vmatpush3.bf16.msra.mxu0 %v6344_v30 }
 0x196   : > { %5721 = vmatpush3.bf16.msra.mxu1 %v6345_v32  ;;  %5728 = vmatprep.subr.bf16.mxu0 %v6347_v35  ;;  %v646_v26 = vpack.c.bf16 %v512_v22, %v512_v22  ;;  %v513_v27 = vcombine.high %v511_v23, %v511_v23  ;;  %v647_v32 = vpack.c.bf16 %v511_v23, %v511_v23  ;;  %v6385_v35 = vld [vmem:[%s6881_s26 + $0x9c8] sm:$0xff]   ;;  %v6416_v23 = vld [vmem:[%s6881_s26 + $0xa80] sm:$0xff]  }
 0x197   : > { %5750 = vmatprep.subr.bf16.mxu1 %v6348_v37  ;;  %v6387_v37 = vld [vmem:[%s6881_s26 + $0x988] sm:$0xff]  }
 0x198   : > { %4326 = vmatmul.mubr.bf16.vlgmr.msra.gmra.mrb[28].mxu0 %v641_v40  ;;  %v648_v30 = vpack.c.bf16 %v513_v27, %v513_v27  ;;  %v6390_v40 = vld [vmem:[%s6881_s26 + $0x910] sm:$0xff]   ;;  %v6419_v27 = vld [vmem:[%s6881_s26 + $0xa08] sm:$0xff]  }
 0x199   : > { %4366 = vmatmul.mubr.bf16.vlgmr.msra.gmra.mrb[28].mxu1 %v643_v41  ;;  %5729 = vmatpush3.bf16.msra.mxu0 %v6349_v38  ;;  %v6388_v38 = vld [vmem:[%s6881_s26 + $0x950] sm:$0xff]  }
 0x19a   : > { %5751 = vmatpush3.bf16.msra.mxu1 %v6350_v42  ;;  %5730 = vmatprep.subr.bf16.mxu0 %v6351_v44  ;;  %v6391_v41 = vld [vmem:[%s6881_s26 + $0x990] sm:$0xff]   ;;  %v6392_v42 = vld [vmem:[%s6881_s26 + $0x958] sm:$0xff]  }
 0x19b   : > { %5752 = vmatprep.subr.bf16.mxu1 %v6352_v45  ;;  %4405 = vmatprep.mubr.bf16.mxu0 %v646_v26  ;;  %v6393_v44 = vld [vmem:[%s6881_s26 + $0x9d8] sm:$0xff]   ;;  %v6418_v26 = vld [vmem:[%s6881_s26 + $0xac8] sm:$0xff]  }
 0x19c   : > { %4445 = vmatprep.mubr.bf16.mxu1 %v648_v30  ;;  %v6394_v45 = vld [vmem:[%s6881_s26 + $0x918] sm:$0xff]   ;;  %v6422_v30 = vld [vmem:[%s6881_s26 + $0xad0] sm:$0xff]  }
 0x19d   : > { %5731 = vmatpush3.bf16.msra.mxu0 %v6353_v46  ;;  %v6395_v46 = vld [vmem:[%s6881_s26 + $0x998] sm:$0xff]  }
 0x19e   : > { %5753 = vmatpush3.bf16.msra.mxu1 %v6354_v47  ;;  %5732 = vmatprep.subr.bf16.mxu0 %v6355_v48  ;;  %v6396_v47 = vld [vmem:[%s6881_s26 + $0x960] sm:$0xff]  }
 0x19f   : > { %5754 = vmatprep.subr.bf16.mxu1 %v6356_v49  ;;  %v6397_v48 = vld [vmem:[%s6881_s26 + $0x9e0] sm:$0xff]  }
 0x1a0   : > { %v6398_v49 = vld [vmem:[%s6881_s26 + $0x920] sm:$0xff]  }
 0x1a1   : > { %5733 = vmatpush3.bf16.msra.mxu0 %v6357_v50  ;;  %v6399_v50 = vld [vmem:[%s6881_s26 + $0x9a0] sm:$0xff]  }
 0x1a2   : > { %5755 = vmatpush3.bf16.msra.mxu1 %v6358_v51  ;;  %5734 = vmatprep.subr.bf16.mxu0 %v6359_v52  ;;  %v6400_v51 = vld [vmem:[%s6881_s26 + $0x968] sm:$0xff]  }
 0x1a3   : > { %5756 = vmatprep.subr.bf16.mxu1 %v6360_v53  ;;  %v6401_v52 = vld [vmem:[%s6881_s26 + $0x9e8] sm:$0xff]  }
 0x1a4   : > { %v6402_v53 = vld [vmem:[%s6881_s26 + $0x928] sm:$0xff]  }
 0x1a5   : > { %5735 = vmatpush3.bf16.msra.mxu0 %v6361_v54  ;;  %v6403_v54 = vld [vmem:[%s6881_s26 + $0x9a8] sm:$0xff]  }
 0x1a6   : > { %5757 = vmatpush3.bf16.msra.mxu1 %v6362_v55  ;;  %5736 = vmatprep.subr.bf16.mxu0 %v6363_v56  ;;  %v6404_v55 = vld [vmem:[%s6881_s26 + $0x970] sm:$0xff]  }
 0x1a7   : > { %5758 = vmatprep.subr.bf16.mxu1 %v6364_v57  ;;  %v6405_v56 = vld [vmem:[%s6881_s26 + $0x9f0] sm:$0xff]  }
 0x1a9   : > { %5737 = vmatpush3.bf16.msra.mxu0 %v6365_v58 }
 0x1aa   : > { %5759 = vmatpush3.bf16.msra.mxu1 %v6366_v59  ;;  %5738 = vmatprep.subr.bf16.mxu0 %v6367_v60  ;;  %v6406_v59 = vld [vmem:[%s6881_s26 + $0x930] sm:$0xff]  }
 0x1ab   : > { %5760 = vmatprep.subr.bf16.mxu1 %v6368_v61  ;;  %v5436_v2 = vpop.f32.mrb[4].mxu0  ;;  %v6407_v60 = vld [vmem:[%s6881_s26 + $0x9b0] sm:$0xff]  }
 0x1ac   : > { %v5458_v3 = vpop.f32.mrb[4].mxu1  ;;  %v5437_v6 = vpop.f32.mrb[5].mxu0 }
 0x1ad   : > { %v5459_v7 = vpop.f32.mrb[5].mxu1  ;;  %v5438_v9 = vadd.f32 %v5437_v6, %v5436_v2  ;;  %v5439_v11 = vpop.f32.mrb[6].mxu0  ;;  %5739 = vmatpush3.bf16.msra.mxu0 %v6369_v62 }
 0x1ae   : > { %v5460_v10 = vadd.f32 %v5459_v7, %v5458_v3  ;;  %v5461_v12 = vpop.f32.mrb[6].mxu1  ;;  %5761 = vmatpush3.bf16.msra.mxu1 %v6370_v63  ;;  %v5440_v15 = vpop.f32.mrb[7].mxu0  ;;  %5740 = vmatprep.subr.bf16.mxu0 %v6371_v0  ;;  %v6408_v3 = vld [vmem:[%s6881_s26 + $0x978] sm:$0xff]  }
 0x1af   : > { %v5462_v16 = vpop.f32.mrb[7].mxu1  ;;  %5762 = vmatprep.subr.bf16.mxu1 %v6372_v1  ;;  %v3848_v19 = vadd.f32 %v5438_v9, %v7179_v29  ;;  %v6382_v29 = vld [vmem:[%s6881_s26 + $0x900] sm:$0xff]   ;;  %v6410_v9 = vld [vmem:[%s6881_s26 + $0x938] sm:$0xff]  }
 0x1b0   : > { %v6413_v16 = vld [vmem:[%s6881_s26 + $0xa40] sm:$0xff]  }
 0x1b1   : > { %v7220_v24 = vadd.f32 %v5460_v10, %v3848_v19  ;;  %5741 = vmatpush3.bf16.msra.mxu0 %v6373_v4  ;;  %v6409_v4 = vld [vmem:[%s6881_s26 + $0x9f8] sm:$0xff]  }
 0x1b2   : > { %5763 = vmatpush3.bf16.msra.mxu1 %v6374_v5  ;;  %5742 = vmatprep.subr.bf16.mxu0 %v6375_v8  ;;  %v345_v8 = vld [vmem:[%s6930_s13 + $0x48] sm:$0xff] }
 0x1b3   : > { %5764 = vmatprep.subr.bf16.mxu1 %v6376_v13  ;;  %v521_v10 = vrot.slane %v345_v8, %v6935_v43  ;;  %v514_v11 = vcombine.high %v345_v8, %v345_v8  ;;  %v6411_v13 = vld [vmem:[%s6881_s26 + $0x9b8] sm:$0xff]   ;;  %v6447_v8 = vld [vmem:[%s6881_s26 + $0xbc0] sm:$0xff]  }
 0x1b5   : > { %5743 = vmatpush3.bf16.msra.mxu0 %v6377_v20  ;;  %v529_v14 = vcombine.high %v521_v10, %v521_v10  ;;  %v528_v15 = vrot.slane %v514_v11, %v6935_v43  ;;  %v649_v20 = vpack.c.bf16 %v521_v10, %v521_v10 }
 0x1b6   : > { %5765 = vmatpush3.bf16.msra.mxu1 %v6378_v21  ;;  %5772 = vmatprep.subr.bf16.mxu0 %v6380_v25  ;;  %v6415_v21 = vld [vmem:[%s6881_s26 + $0xa00] sm:$0xff]   ;;  %v6417_v25 = vld [vmem:[%s6881_s26 + $0xa48] sm:$0xff]  }
 0x1b7   : > { %5794 = vmatprep.subr.bf16.mxu1 %v6381_v28  ;;  %v650_v18 = vpack.c.bf16 %v529_v14, %v529_v14  ;;  %v530_v19 = vcombine.high %v528_v15, %v528_v15  ;;  %v651_v22 = vpack.c.bf16 %v528_v15, %v528_v15  ;;  %v6420_v28 = vld [vmem:[%s6881_s26 + $0xa88] sm:$0xff]  }
 0x1b8   : > { %4406 = vmatmul.mubr.bf16.vlgmr.msra.gmra.mrb[32].mxu0 %v645_v31  ;;  %v6423_v31 = vld [vmem:[%s6881_s26 + $0xa10] sm:$0xff]   ;;  %v6450_v14 = vld [vmem:[%s6881_s26 + $0xb48] sm:$0xff]  }
 0x1b9   : > { %4446 = vmatmul.mubr.bf16.vlgmr.msra.gmra.mrb[32].mxu1 %v647_v32  ;;  %5773 = vmatpush3.bf16.msra.mxu0 %v6382_v29  ;;  %v6421_v29 = vld [vmem:[%s6881_s26 + $0xa50] sm:$0xff]  }
 0x1ba   : > { %5795 = vmatpush3.bf16.msra.mxu1 %v6383_v33  ;;  %5774 = vmatprep.subr.bf16.mxu0 %v6384_v34  ;;  %v6424_v32 = vld [vmem:[%s6881_s26 + $0xa90] sm:$0xff]   ;;  %v6425_v33 = vld [vmem:[%s6881_s26 + $0xa58] sm:$0xff]  }
 0x1bb   : > { %5796 = vmatprep.subr.bf16.mxu1 %v6385_v35  ;;  %4485 = vmatprep.mubr.bf16.mxu0 %v650_v18  ;;  %v6426_v34 = vld [vmem:[%s6881_s26 + $0xad8] sm:$0xff]   ;;  %v6452_v18 = vld [vmem:[%s6881_s26 + $0xb08] sm:$0xff]  }
 0x1bc   : > { %v6427_v35 = vld [vmem:[%s6881_s26 + $0xa18] sm:$0xff]  }
 0x1bd   : > { %5775 = vmatpush3.bf16.msra.mxu0 %v6386_v36  ;;  %v6428_v36 = vld [vmem:[%s6881_s26 + $0xa98] sm:$0xff]  }
 0x1be   : > { %5797 = vmatpush3.bf16.msra.mxu1 %v6387_v37  ;;  %5776 = vmatprep.subr.bf16.mxu0 %v6388_v38  ;;  %v6429_v37 = vld [vmem:[%s6881_s26 + $0xa60] sm:$0xff]  }
 0x1bf   : > { %5798 = vmatprep.subr.bf16.mxu1 %v6389_v39  ;;  %v6430_v38 = vld [vmem:[%s6881_s26 + $0xae0] sm:$0xff]  }
 0x1c0   : > { %v6431_v39 = vld [vmem:[%s6881_s26 + $0xa20] sm:$0xff]  }
 0x1c1   : > { %5777 = vmatpush3.bf16.msra.mxu0 %v6390_v40  ;;  %v6432_v40 = vld [vmem:[%s6881_s26 + $0xaa0] sm:$0xff]  }
 0x1c2   : > { %5799 = vmatpush3.bf16.msra.mxu1 %v6391_v41  ;;  %5778 = vmatprep.subr.bf16.mxu0 %v6392_v42  ;;  %v6433_v41 = vld [vmem:[%s6881_s26 + $0xa68] sm:$0xff]  }
 0x1c3   : > { %5800 = vmatprep.subr.bf16.mxu1 %v6393_v44  ;;  %v6434_v42 = vld [vmem:[%s6881_s26 + $0xae8] sm:$0xff]  }
 0x1c4   : > { %v6435_v44 = vld [vmem:[%s6881_s26 + $0xa28] sm:$0xff]  }
 0x1c5   : > { %5779 = vmatpush3.bf16.msra.mxu0 %v6394_v45  ;;  %v6436_v45 = vld [vmem:[%s6881_s26 + $0xaa8] sm:$0xff]  }
 0x1c6   : > { %5801 = vmatpush3.bf16.msra.mxu1 %v6395_v46  ;;  %5780 = vmatprep.subr.bf16.mxu0 %v6396_v47  ;;  %v6437_v46 = vld [vmem:[%s6881_s26 + $0xa70] sm:$0xff]  }
 0x1c7   : > { %5802 = vmatprep.subr.bf16.mxu1 %v6397_v48 }
 0x1c9   : > { %5781 = vmatpush3.bf16.msra.mxu0 %v6398_v49  ;;  %v6438_v49 = vld [vmem:[%s6881_s26 + $0xaf0] sm:$0xff]  }
 0x1ca   : > { %5803 = vmatpush3.bf16.msra.mxu1 %v6399_v50  ;;  %5782 = vmatprep.subr.bf16.mxu0 %v6400_v51  ;;  %v6439_v50 = vld [vmem:[%s6881_s26 + $0xa30] sm:$0xff]  }
 0x1cb   : > { %5804 = vmatprep.subr.bf16.mxu1 %v6401_v52  ;;  %v5480_v57 = vpop.f32.mrb[8].mxu0 }
 0x1cc   : > { %v5502_v58 = vpop.f32.mrb[8].mxu1  ;;  %v5481_v61 = vpop.f32.mrb[9].mxu0 }
 0x1cd   : > { %v5503_v62 = vpop.f32.mrb[9].mxu1  ;;  %v5482_v63 = vadd.f32 %v5481_v61, %v5480_v57  ;;  %v5483_v1 = vpop.f32.mrb[10].mxu0  ;;  %5783 = vmatpush3.bf16.msra.mxu0 %v6402_v53  ;;  %v6440_v53 = vld [vmem:[%s6881_s26 + $0xab0] sm:$0xff]  }
 0x1ce   : > { %v5504_v0 = vadd.f32 %v5503_v62, %v5502_v58  ;;  %v5505_v2 = vpop.f32.mrb[10].mxu1  ;;  %5805 = vmatpush3.bf16.msra.mxu1 %v6403_v54  ;;  %v5484_v5 = vpop.f32.mrb[11].mxu0  ;;  %5784 = vmatprep.subr.bf16.mxu0 %v6404_v55  ;;  %v6441_v58 = vld [vmem:[%s6881_s26 + $0xa78] sm:$0xff]  }
 0x1cf   : > { %v5506_v6 = vpop.f32.mrb[11].mxu1  ;;  %5806 = vmatprep.subr.bf16.mxu1 %v6405_v56  ;;  %v3928_v7 = vadd.f32 %v5482_v63, %v7220_v24  ;;  %v652_v24 = vpack.c.bf16 %v530_v19, %v530_v19  ;;  %v6443_v63 = vld [vmem:[%s6881_s26 + $0xa38] sm:$0xff]   ;;  %v6446_v5 = vld [vmem:[%s6881_s26 + $0xb40] sm:$0xff]   ;;  %v6454_v19 = vld [vmem:[%s6881_s26 + $0xb50] sm:$0xff]  }
 0x1d0   : > { %v6444_v2 = vld [vmem:[%s6881_s26 + $0xab8] sm:$0xff]  }
 0x1d1   : > { %v7256_v12 = vadd.f32 %v5504_v0, %v3928_v7  ;;  %5785 = vmatpush3.bf16.msra.mxu0 %v6406_v59  ;;  %4525 = vmatprep.mubr.bf16.mxu1 %v652_v24  ;;  %v6442_v59 = vld [vmem:[%s6881_s26 + $0xaf8] sm:$0xff]   ;;  %v346_v0 = vld [vmem:[%s6930_s13 + $0x50] sm:$0xff] }
 0x1d2   : > { %5807 = vmatpush3.bf16.msra.mxu1 %v6407_v60  ;;  %5786 = vmatprep.subr.bf16.mxu0 %v6408_v3  ;;  %v538_v3 = vrot.slane %v346_v0, %v6935_v43  ;;  %v6457_v24 = vld [vmem:[%s6881_s26 + $0xb90] sm:$0xff]  }
 0x1d3   : > { %5808 = vmatprep.subr.bf16.mxu1 %v6409_v4  ;;  %v531_v4 = vcombine.high %v346_v0, %v346_v0 }
 0x1d4   : > { %v546_v6 = vcombine.high %v538_v3, %v538_v3 }
 0x1d5   : > { %5787 = vmatpush3.bf16.msra.mxu0 %v6410_v9  ;;  %v545_v7 = vrot.slane %v531_v4, %v6935_v43  ;;  %v653_v9 = vpack.c.bf16 %v538_v3, %v538_v3 }
 0x1d6   : > { %5809 = vmatpush3.bf16.msra.mxu1 %v6411_v13  ;;  %5816 = vmatprep.subr.bf16.mxu0 %v6413_v16  ;;  %v654_v10 = vpack.c.bf16 %v546_v6, %v546_v6  ;;  %v6449_v16 = vld [vmem:[%s6881_s26 + $0xb80] sm:$0xff]  }
 0x1d7   : > { %5838 = vmatprep.subr.bf16.mxu1 %v6414_v17  ;;  %v547_v11 = vcombine.high %v545_v7, %v545_v7  ;;  %v655_v13 = vpack.c.bf16 %v545_v7, %v545_v7  ;;  %v6451_v17 = vld [vmem:[%s6881_s26 + $0xbc8] sm:$0xff]  }
 0x1d8   : > { %4486 = vmatmul.mubr.bf16.vlgmr.msra.gmra.mrb[36].mxu0 %v649_v20  ;;  %v6453_v20 = vld [vmem:[%s6881_s26 + $0xb88] sm:$0xff]  }
 0x1d9   : > { %4526 = vmatmul.mubr.bf16.vlgmr.msra.gmra.mrb[36].mxu1 %v651_v22  ;;  %5817 = vmatpush3.bf16.msra.mxu0 %v6415_v21  ;;  %v656_v15 = vpack.c.bf16 %v547_v11, %v547_v11  ;;  %v6455_v21 = vld [vmem:[%s6881_s26 + $0xbd0] sm:$0xff]  }
 0x1da   : > { %5839 = vmatpush3.bf16.msra.mxu1 %v6416_v23  ;;  %5818 = vmatprep.subr.bf16.mxu0 %v6417_v25  ;;  %v6456_v22 = vld [vmem:[%s6881_s26 + $0xb10] sm:$0xff]   ;;  %v6458_v23 = vld [vmem:[%s6881_s26 + $0xb58] sm:$0xff]  }
 0x1db   : > { %5840 = vmatprep.subr.bf16.mxu1 %v6418_v26  ;;  %4565 = vmatprep.mubr.bf16.mxu0 %v654_v10  ;;  %v6459_v25 = vld [vmem:[%s6881_s26 + $0xbd8] sm:$0xff]  }
 0x1dc   : > { %4605 = vmatprep.mubr.bf16.mxu1 %v656_v15  ;;  %v6460_v26 = vld [vmem:[%s6881_s26 + $0xb18] sm:$0xff]  }
 0x1dd   : > { %5819 = vmatpush3.bf16.msra.mxu0 %v6419_v27  ;;  %v6462_v27 = vld [vmem:[%s6881_s26 + $0xb60] sm:$0xff]  }
 0x1de   : > { %5841 = vmatpush3.bf16.msra.mxu1 %v6420_v28  ;;  %5820 = vmatprep.subr.bf16.mxu0 %v6421_v29  ;;  %v6461_v28 = vld [vmem:[%s6881_s26 + $0xb98] sm:$0xff]   ;;  %v6463_v29 = vld [vmem:[%s6881_s26 + $0xbe0] sm:$0xff]  }
 0x1df   : > { %5842 = vmatprep.subr.bf16.mxu1 %v6422_v30  ;;  %v6464_v30 = vld [vmem:[%s6881_s26 + $0xb20] sm:$0xff]  }
 0x1e1   : > { %5821 = vmatpush3.bf16.msra.mxu0 %v6423_v31  ;;  %v6466_v31 = vld [vmem:[%s6881_s26 + $0xb68] sm:$0xff]  }
 0x1e2   : > { %5843 = vmatpush3.bf16.msra.mxu1 %v6424_v32  ;;  %5822 = vmatprep.subr.bf16.mxu0 %v6425_v33  ;;  %v6465_v32 = vld [vmem:[%s6881_s26 + $0xba0] sm:$0xff]   ;;  %v6467_v33 = vld [vmem:[%s6881_s26 + $0xbe8] sm:$0xff]  }
 0x1e3   : > { %5844 = vmatprep.subr.bf16.mxu1 %v6426_v34  ;;  %v6468_v34 = vld [vmem:[%s6881_s26 + $0xb28] sm:$0xff]  }
 0x1e5   : > { %5823 = vmatpush3.bf16.msra.mxu0 %v6427_v35  ;;  %v6470_v35 = vld [vmem:[%s6881_s26 + $0xb70] sm:$0xff]  }
 0x1e6   : > { %5845 = vmatpush3.bf16.msra.mxu1 %v6428_v36  ;;  %5824 = vmatprep.subr.bf16.mxu0 %v6429_v37 }
 0x1e7   : > { %5846 = vmatprep.subr.bf16.mxu1 %v6430_v38  ;;  %v6469_v38 = vld [vmem:[%s6881_s26 + $0xba8] sm:$0xff]  }
 0x1e9   : > { %5825 = vmatpush3.bf16.msra.mxu0 %v6431_v39  ;;  %v6471_v39 = vld [vmem:[%s6881_s26 + $0xbf0] sm:$0xff]  }
 0x1ea   : > { %5847 = vmatpush3.bf16.msra.mxu1 %v6432_v40  ;;  %5826 = vmatprep.subr.bf16.mxu0 %v6433_v41 }
 0x1eb   : > { %v5524_v47 = vpop.f32.mrb[12].mxu0  ;;  %5848 = vmatprep.subr.bf16.mxu1 %v6434_v42 }
 0x1ec   : > { %v5546_v48 = vpop.f32.mrb[12].mxu1  ;;  %v5525_v51 = vpop.f32.mrb[13].mxu0 }
 0x1ed   : > { %v5547_v52 = vpop.f32.mrb[13].mxu1  ;;  %v5526_v54 = vadd.f32 %v5525_v51, %v5524_v47  ;;  %v5527_v56 = vpop.f32.mrb[14].mxu0  ;;  %5827 = vmatpush3.bf16.msra.mxu0 %v6435_v44  ;;  %v6472_v47 = vld [vmem:[%s6881_s26 + $0xb30] sm:$0xff]  }
 0x1ee   : > { %v5548_v55 = vadd.f32 %v5547_v52, %v5546_v48  ;;  %v5549_v57 = vpop.f32.mrb[14].mxu1  ;;  %5849 = vmatpush3.bf16.msra.mxu1 %v6436_v45  ;;  %v5528_v60 = vpop.f32.mrb[15].mxu0  ;;  %5828 = vmatprep.subr.bf16.mxu0 %v6437_v46  ;;  %v6474_v48 = vld [vmem:[%s6881_s26 + $0xb78] sm:$0xff]   ;;  %v6473_v52 = vld [vmem:[%s6881_s26 + $0xbb0] sm:$0xff]  }
 0x1ef   : > { %v5550_v61 = vpop.f32.mrb[15].mxu1  ;;  %v4008_v62 = vadd.f32 %v5526_v54, %v7256_v12  ;;  %5850 = vmatprep.subr.bf16.mxu1 %v6438_v49  ;;  %v6448_v12 = vld [vmem:[%s6881_s26 + $0xb00] sm:$0xff]   ;;  %v347_v56 = vld [vmem:[%s6930_s13 + $0x58] sm:$0xff] }
 0x1f0   : > { %v555_v57 = vrot.slane %v347_v56, %v6935_v43 }
 0x1f1   : > { %v7293_v1 = vadd.f32 %v5548_v55, %v4008_v62  ;;  %5829 = vmatpush3.bf16.msra.mxu0 %v6439_v50  ;;  %v6476_v55 = vld [vmem:[%s6881_s26 + $0xb38] sm:$0xff]  }
 0x1f2   : > { %5851 = vmatpush3.bf16.msra.mxu1 %v6440_v53  ;;  %5830 = vmatprep.subr.bf16.mxu0 %v6441_v58  ;;  %v6475_v53 = vld [vmem:[%s6881_s26 + $0xbf8] sm:$0xff]   ;;  %v548_v58 = vcombine.high %v347_v56, %v347_v56  ;;  %v563_v60 = vcombine.high %v555_v57, %v555_v57  ;;  %v657_v62 = vpack.c.bf16 %v555_v57, %v555_v57 }
 0x1f3   : > { %5852 = vmatprep.subr.bf16.mxu1 %v6442_v59  ;;  %v6477_v59 = vld [vmem:[%s6881_s26 + $0xbb8] sm:$0xff]  }
 0x1f4   : > { %v562_v61 = vrot.slane %v548_v58, %v6935_v43 }
 0x1f5   : > { %5831 = vmatpush3.bf16.msra.mxu0 %v6443_v63  ;;  %v658_v63 = vpack.c.bf16 %v563_v60, %v563_v60 }
 0x1f6   : > { %5853 = vmatpush3.bf16.msra.mxu1 %v6444_v2  ;;  %5860 = vmatprep.subr.bf16.mxu0 %v6446_v5  ;;  %v564_v0 = vcombine.high %v562_v61, %v562_v61 }
 0x1f7   : > { %5882 = vmatprep.subr.bf16.mxu1 %v6447_v8 }
 0x1f8   : > { %4566 = vmatmul.mubr.bf16.vlgmr.msra.gmra.mrb[40].mxu0 %v653_v9  ;;  %v660_v2 = vpack.c.bf16 %v564_v0, %v564_v0 }
 0x1f9   : > { %5861 = vmatpush3.bf16.msra.mxu0 %v6448_v12  ;;  %4606 = vmatmul.mubr.bf16.vlgmr.msra.gmra.mrb[40].mxu1 %v655_v13 }
 0x1fa   : > { %5862 = vmatprep.subr.bf16.mxu0 %v6450_v14  ;;  %5883 = vmatpush3.bf16.msra.mxu1 %v6449_v16 }
 0x1fb   : > { %5884 = vmatprep.subr.bf16.mxu1 %v6451_v17  ;;  %4645 = vmatprep.mubr.bf16.mxu0 %v658_v63 }
 0x1fc   : > { %4685 = vmatprep.mubr.bf16.mxu1 %v660_v2 }
 0x1fd   : > { %5863 = vmatpush3.bf16.msra.mxu0 %v6452_v18 }
 0x1fe   : > { %5864 = vmatprep.subr.bf16.mxu0 %v6454_v19  ;;  %5885 = vmatpush3.bf16.msra.mxu1 %v6453_v20 }
 0x1ff   : > { %5886 = vmatprep.subr.bf16.mxu1 %v6455_v21 }
 0x201   : > { %5865 = vmatpush3.bf16.msra.mxu0 %v6456_v22 }
 0x202   : > { %5866 = vmatprep.subr.bf16.mxu0 %v6458_v23  ;;  %5887 = vmatpush3.bf16.msra.mxu1 %v6457_v24 }
 0x203   : > { %5888 = vmatprep.subr.bf16.mxu1 %v6459_v25 }
 0x205   : > { %5867 = vmatpush3.bf16.msra.mxu0 %v6460_v26 }
 0x206   : > { %5868 = vmatprep.subr.bf16.mxu0 %v6462_v27  ;;  %5889 = vmatpush3.bf16.msra.mxu1 %v6461_v28 }
 0x207   : > { %5890 = vmatprep.subr.bf16.mxu1 %v6463_v29 }
 0x209   : > { %5869 = vmatpush3.bf16.msra.mxu0 %v6464_v30 }
 0x20a   : > { %5870 = vmatprep.subr.bf16.mxu0 %v6466_v31  ;;  %5891 = vmatpush3.bf16.msra.mxu1 %v6465_v32 }
 0x20b   : > { %v5568_v36 = vpop.f32.mrb[16].mxu0  ;;  %5892 = vmatprep.subr.bf16.mxu1 %v6467_v33 }
 0x20c   : > { %v5590_v37 = vpop.f32.mrb[16].mxu1  ;;  %v5569_v40 = vpop.f32.mrb[17].mxu0 }
 0x20d   : > { %v5591_v41 = vpop.f32.mrb[17].mxu1  ;;  %v5570_v42 = vadd.f32 %v5569_v40, %v5568_v36  ;;  %v5571_v45 = vpop.f32.mrb[18].mxu0  ;;  %5871 = vmatpush3.bf16.msra.mxu0 %v6468_v34 }
 0x20e   : > { %v5592_v44 = vadd.f32 %v5591_v41, %v5590_v37  ;;  %v5593_v46 = vpop.f32.mrb[18].mxu1  ;;  %v5572_v49 = vpop.f32.mrb[19].mxu0  ;;  %5872 = vmatprep.subr.bf16.mxu0 %v6470_v35  ;;  %5893 = vmatpush3.bf16.msra.mxu1 %v6469_v38 }
 0x20f   : > { %v5594_v50 = vpop.f32.mrb[19].mxu1  ;;  %v4088_v51 = vadd.f32 %v5570_v42, %v7293_v1  ;;  %5894 = vmatprep.subr.bf16.mxu1 %v6471_v39  ;;  %v659_v1 = vpack.c.bf16 %v562_v61, %v562_v61 }
 0x211   : > { %v4128_v54 = vadd.f32 %v5592_v44, %v4088_v51  ;;  %5873 = vmatpush3.bf16.msra.mxu0 %v6472_v47 }
 0x212   : > { %5874 = vmatprep.subr.bf16.mxu0 %v6474_v48  ;;  %5895 = vmatpush3.bf16.msra.mxu1 %v6473_v52 }
 0x213   : > { %5896 = vmatprep.subr.bf16.mxu1 %v6475_v53 }
 0x215   : > { %5875 = vmatpush3.bf16.msra.mxu0 %v6476_v55 }
 0x216   : > { %5897 = vmatpush3.bf16.msra.mxu1 %v6477_v59 }
 0x218   : > { %4646 = vmatmul.mubr.bf16.vlgmr.msra.gmra.mrb[44].mxu0 %v657_v62 }
 0x219   : > { %4686 = vmatmul.mubr.bf16.vlgmr.msra.gmra.mrb[44].mxu1 %v659_v1 }
 0x22b   : > { %v5612_v3 = vpop.f32.mrb[20].mxu0 }
 0x22c   : > { %v5634_v4 = vpop.f32.mrb[20].mxu1  ;;  %v5613_v5 = vpop.f32.mrb[21].mxu0 }
 0x22d   : > { %v5635_v6 = vpop.f32.mrb[21].mxu1  ;;  %v5614_v7 = vadd.f32 %v5613_v5, %v5612_v3  ;;  %v5615_v9 = vpop.f32.mrb[22].mxu0 }
 0x22e   : > { %v5636_v8 = vadd.f32 %v5635_v6, %v5634_v4  ;;  %v5637_v10 = vpop.f32.mrb[22].mxu1  ;;  %v5616_v43 = vpop.f32.mrb[23].mxu0 }
 0x22f   : > { %v5638_v11 = vpop.f32.mrb[23].mxu1  ;;  %v4168_v12 = vadd.f32 %v5614_v7, %v4128_v54 }
 0x231   : > { %v4208_v13 = vadd.f32 %v5636_v8, %v4168_v12 }
 0x24b   : > { %v5656_v14 = vpop.f32.mrb[24].mxu0 }
 0x24c   : > { %v5678_v15 = vpop.f32.mrb[24].mxu1  ;;  %v5657_v16 = vpop.f32.mrb[25].mxu0 }
 0x24d   : > { %v5679_v17 = vpop.f32.mrb[25].mxu1  ;;  %v5658_v18 = vadd.f32 %v5657_v16, %v5656_v14  ;;  %v5659_v20 = vpop.f32.mrb[26].mxu0 }
 0x24e   : > { %v5680_v19 = vadd.f32 %v5679_v17, %v5678_v15  ;;  %v5681_v21 = vpop.f32.mrb[26].mxu1  ;;  %v5660_v22 = vpop.f32.mrb[27].mxu0  ;;  %v348_v20 = vld [vmem:[#allocation2] sm:$0x3] }
 0x24f   : > { %v5682_v23 = vpop.f32.mrb[27].mxu1  ;;  %v4248_v24 = vadd.f32 %v5658_v18, %v4208_v13 }
 0x251   : > { %v4288_v25 = vadd.f32 %v5680_v19, %v4248_v24  ;;  %v4709_v24 = vld [vmem:[%s7414_s3] sm:$0xff] (!%p5366_p12) }
 0x26b   : > { %v5700_v26 = vpop.f32.mrb[28].mxu0 }
 0x26c   : > { %v5722_v27 = vpop.f32.mrb[28].mxu1  ;;  %v5701_v28 = vpop.f32.mrb[29].mxu0 }
 0x26d   : > { %v5723_v29 = vpop.f32.mrb[29].mxu1  ;;  %v5702_v30 = vadd.f32 %v5701_v28, %v5700_v26  ;;  %v5703_v32 = vpop.f32.mrb[30].mxu0  ;;  %v4711_v26 = vld [vmem:[%s7414_s3 + $0x10] sm:$0xff] (!%p5366_p12) }
 0x26e   : > { %v5724_v31 = vadd.f32 %v5723_v29, %v5722_v27  ;;  %v5725_v33 = vpop.f32.mrb[30].mxu1  ;;  %v5704_v34 = vpop.f32.mrb[31].mxu0  ;;  %v6655_v27 = vmov (!%p5366_p12), 0.0|0.0   ;;  %v4712_v29 = vld [vmem:[%s7414_s3 + $0x18] sm:$0xff] (!%p5366_p12)  ;;  %v4713_v32 = vld [vmem:[%s7414_s3 + $0x20] sm:$0xff] (!%p5366_p12) }
 0x26f   : > { %v5726_v35 = vpop.f32.mrb[31].mxu1  ;;  %v4328_v36 = vadd.f32 %v5702_v30, %v4288_v25  ;;  %v4710_v25 = vld [vmem:[%s7414_s3 + $0x8] sm:$0xff] (!%p5366_p12)  ;;  %5972 = vmatprep.subr.bf16.mxu0 (!%p5366_p12), %v6655_v27  ;;  %v6657_v30 = vmov (!%p5366_p12), 0.0   ;;  %5996 = vmatprep.subr.bf16.mxu1 (!%p5366_p12), %v6655_v27  ;;  %v4803_v34 = vld [vmem:[%s7416_s5] sm:$0xff] (!%p5366_p12) }
 0x270   : > { %v5973_v28 = vpack.c.bf16 (!%p5366_p12), %v4710_v25, %v4709_v24  ;;  %5958 = vmatprep.mubr.msk.f32.mxu0 (!%p5366_p12), %vm6656_vm0, %v6657_v30  ;;  %5969 = vmatprep.mubr.msk.f32.mxu1 (!%p5366_p12), %vm6656_vm0, %v6657_v30  ;;  %v4714_v33 = vld [vmem:[%s7414_s3 + $0x28] sm:$0xff] (!%p5366_p12) }
 0x271   : > { %v4368_v37 = vadd.f32 %v5724_v31, %v4328_v36  ;;  %v5976_v31 = vpack.c.bf16 (!%p5366_p12), %v4712_v29, %v4711_v26  ;;  %v4804_v35 = vld [vmem:[%s7416_s5 + $0x8] sm:$0xff] (!%p5366_p12)  ;;  %v5979_v36 = vpack.c.bf16 (!%p5366_p12), %v4714_v33, %v4713_v32 }
 0x272   : > { %5974 = vmatpush3.bf16.msra.mxu0 (!%p5366_p12), %v5973_v28 }
 0x273   : > { %5975 = vmatprep.subr.bf16.mxu0 (!%p5366_p12), %v6655_v27 }
 0x276   : > { %5977 = vmatpush3.bf16.msra.mxu0 (!%p5366_p12), %v5976_v31 }
 0x277   : > { %5978 = vmatprep.subr.bf16.mxu0 (!%p5366_p12), %v6655_v27 }
 0x27a   : > { %5980 = vmatpush3.bf16.msra.mxu0 (!%p5366_p12), %v5979_v36 }
 0x27b   : > { %5981 = vmatprep.subr.bf16.mxu0 (!%p5366_p12), %v6655_v27 }
 0x28b   : > { %v5744_v38 = vpop.f32.mrb[32].mxu0 }
 0x28c   : > { %v5766_v39 = vpop.f32.mrb[32].mxu1  ;;  %v5745_v40 = vpop.f32.mrb[33].mxu0 }
 0x28d   : > { %v5767_v41 = vpop.f32.mrb[33].mxu1  ;;  %v5746_v42 = vadd.f32 %v5745_v40, %v5744_v38  ;;  %v5747_v45 = vpop.f32.mrb[34].mxu0  ;;  %v4715_v38 = vld [vmem:[%s7414_s3 + $0x30] sm:$0xff] (!%p5366_p12) }
 0x28e   : > { %v5768_v44 = vadd.f32 %v5767_v41, %v5766_v39  ;;  %v5769_v46 = vpop.f32.mrb[34].mxu1  ;;  %v5748_v47 = vpop.f32.mrb[35].mxu0  ;;  %v4716_v39 = vld [vmem:[%s7414_s3 + $0x38] sm:$0xff] (!%p5366_p12)  ;;  %v4717_v41 = vld [vmem:[%s7414_s3 + $0x40] sm:$0xff] (!%p5366_p12)  ;;  %v4719_v45 = vld [vmem:[%s7414_s3 + $0x50] sm:$0xff] (!%p5366_p12) }
 0x28f   : > { %v5770_v48 = vpop.f32.mrb[35].mxu1  ;;  %v4408_v49 = vadd.f32 %v5746_v42, %v4368_v37  ;;  %v5997_v37 = vpack.c.bf16 (!%p5366_p12), %v4804_v35, %v4803_v34  ;;  %v5982_v40 = vpack.c.bf16 (!%p5366_p12), %v4716_v39, %v4715_v38  ;;  %v4718_v42 = vld [vmem:[%s7414_s3 + $0x48] sm:$0xff] (!%p5366_p12)  ;;  %v4720_v46 = vld [vmem:[%s7414_s3 + $0x58] sm:$0xff] (!%p5366_p12) }
 0x290   : > { %v5988_v47 = vpack.c.bf16 (!%p5366_p12), %v4720_v46, %v4719_v45  ;;  %v4721_v48 = vld [vmem:[%s7414_s3 + $0x60] sm:$0xff] (!%p5366_p12) }
 0x291   : > { %v4448_v50 = vadd.f32 %v5768_v44, %v4408_v49  ;;  %5998 = vmatpush3.bf16.msra.mxu1 (!%p5366_p12), %v5997_v37  ;;  %5983 = vmatpush3.bf16.msra.mxu0 (!%p5366_p12), %v5982_v40  ;;  %v5985_v44 = vpack.c.bf16 (!%p5366_p12), %v4718_v42, %v4717_v41  ;;  %v4722_v49 = vld [vmem:[%s7414_s3 + $0x68] sm:$0xff] (!%p5366_p12) }
 0x292   : > { %5999 = vmatprep.subr.bf16.mxu1 (!%p5366_p12), %v6655_v27  ;;  %5984 = vmatprep.subr.bf16.mxu0 (!%p5366_p12), %v6655_v27 }
 0x295   : > { %5986 = vmatpush3.bf16.msra.mxu0 (!%p5366_p12), %v5985_v44 }
 0x296   : > { %5987 = vmatprep.subr.bf16.mxu0 (!%p5366_p12), %v6655_v27 }
 0x299   : > { %5989 = vmatpush3.bf16.msra.mxu0 (!%p5366_p12), %v5988_v47 }
 0x29a   : > { %5990 = vmatprep.subr.bf16.mxu0 (!%p5366_p12), %v6655_v27 }
 0x2ab   : > { %v5788_v51 = vpop.f32.mrb[36].mxu0 }
 0x2ac   : > { %v5810_v52 = vpop.f32.mrb[36].mxu1  ;;  %v5789_v53 = vpop.f32.mrb[37].mxu0 }
 0x2ad   : > { %v5790_v54 = vadd.f32 %v5789_v53, %v5788_v51  ;;  %v5811_v55 = vpop.f32.mrb[37].mxu1  ;;  %v5791_v56 = vpop.f32.mrb[38].mxu0  ;;  %v4723_v53 = vld [vmem:[%s7414_s3 + $0x70] sm:$0xff] (!%p5366_p12) }
 0x2ae   : > { %v5812_v57 = vadd.f32 %v5811_v55, %v5810_v52  ;;  %v5813_v58 = vpop.f32.mrb[38].mxu1  ;;  %v5792_v59 = vpop.f32.mrb[39].mxu0  ;;  %v5367_v52 = vld [vmem:[#allocation8] ss:$0 sm:$0xff] (!%p5366_p12) }
 0x2af   : > { %v4488_v60 = vadd.f32 %v5790_v54, %v4448_v50  ;;  %v5814_v61 = vpop.f32.mrb[39].mxu1  ;;  %v5991_v50 = vpack.c.bf16 (!%p5366_p12), %v4722_v49, %v4721_v48  ;;  %v4724_v54 = vld [vmem:[%s7414_s3 + $0x78] sm:$0xff] (!%p5366_p12)  ;;  %v4805_v58 = vld [vmem:[%s7416_s5 + $0x10] sm:$0xff] (!%p5366_p12) }
 0x2b0   : > { %v5994_v56 = vpack.c.bf16 (!%p5366_p12), %v4724_v54, %v4723_v53  ;;  %v4806_v59 = vld [vmem:[%s7416_s5 + $0x18] sm:$0xff] (!%p5366_p12)  ;;  %v5368_v61 = vld [vmem:[#allocation9] ss:$0 sm:$0xff] (!%p5366_p12) }
 0x2b1   : > { %v4528_v62 = vadd.f32 %v5812_v57, %v4488_v60  ;;  %5992 = vmatpush3.bf16.msra.mxu0 (!%p5366_p12), %v5991_v50  ;;  %v6000_v60 = vpack.c.bf16 (!%p5366_p12), %v4806_v59, %v4805_v58 }
 0x2b2   : > { %5993 = vmatprep.subr.bf16.mxu0 (!%p5366_p12), %v6655_v27 }
 0x2b3   : > { %6001 = vmatpush3.bf16.msra.mxu1 (!%p5366_p12), %v6000_v60 }
 0x2b5   : > { %5995 = vmatpush3.bf16.msra.mxu0 (!%p5366_p12), %v5994_v56 }
 0x2cb   : > { %v5832_v63 = vpop.f32.mrb[40].mxu0 }
 0x2cc   : > { %v5833_v0 = vpop.f32.mrb[41].mxu0  ;;  %v5854_v1 = vpop.f32.mrb[40].mxu1 }
 0x2cd   : > { %v5834_v2 = vadd.f32 %v5833_v0, %v5832_v63  ;;  %v5835_v3 = vpop.f32.mrb[42].mxu0  ;;  %v5855_v4 = vpop.f32.mrb[41].mxu1 }
 0x2ce   : > { %v5836_v5 = vpop.f32.mrb[43].mxu0  ;;  %v5856_v7 = vadd.f32 %v5855_v4, %v5854_v1  ;;  %v5857_v8 = vpop.f32.mrb[42].mxu1 }
 0x2cf   : > { %v4568_v6 = vadd.f32 %v5834_v2, %v4528_v62  ;;  %v5858_v9 = vpop.f32.mrb[43].mxu1  ;;  %v5369_v2 = vld [vmem:[#allocation3] ss:$0 sm:$0xff] (!%p5366_p12) }
 0x2d1   : > { %v4608_v10 = vadd.f32 %v5856_v7, %v4568_v6 }
 0x2eb   : > { %v5876_v43 = vpop.f32.mrb[44].mxu0 }
 0x2ec   : > { %v5877_v11 = vpop.f32.mrb[45].mxu0  ;;  %v5898_v12 = vpop.f32.mrb[44].mxu1 }
 0x2ed   : > { %v5878_v13 = vadd.f32 %v5877_v11, %v5876_v43  ;;  %v5879_v14 = vpop.f32.mrb[46].mxu0  ;;  %v5899_v15 = vpop.f32.mrb[45].mxu1 }
 0x2ee   : > { %v5880_v16 = vpop.f32.mrb[47].mxu0  ;;  %v5900_v18 = vadd.f32 %v5899_v15, %v5898_v12  ;;  %v5901_v19 = vpop.f32.mrb[46].mxu1 }
 0x2ef   : > { %v4648_v17 = vadd.f32 %v5878_v13, %v4608_v10  ;;  %v5902_v21 = vpop.f32.mrb[47].mxu1  ;;  %4698 = sbr.rel (%p5366_p12) target bundleno = 1228 (0x4cc), region = 72 }
 0x2f1   : > { %v4688_v22 = vadd.f32 %v5900_v18, %v4648_v17 }
 0x2f3   : > { %v4693_v23 = vadd.f32 %v4688_v22, %v348_v20 }
 0x2f5   : > { %4694 = vst [vmem:[#allocation2] sm:$0x3] %v4693_v23 }
 0x2fc   : > { %v4699_v51 = vld [vmem:[#allocation2] sm:$0x3] }
 0x2fd   : > { %v4707_v55 = vadd.f32 %v5367_v52, %v4699_v51 }
 0x2ff   : > { %v4708_v57 = vmax.f32 %v4707_v55, 0.0 }
 0x301   : > { %5959 = vmatmul.mubr.f32.vlgmr.msra.gmra.mrb[0].mxu0 %v4708_v57 }
 0x3d4   : > { %v4798_v62 = vpop.f32.mrb[0].mxu0 }
 0x3d5   : > { %v4799_v63 = vadd.f32 %v5368_v61, %v4798_v62  ;;  %v5960_v0 = vpop.f32.mrb[1].mxu0 }
 0x3d7   : > { %v4802_v1 = vmax.f32 %v4799_v63, 0.0 }
 0x3d9   : > { %5970 = vmatmul.mubr.msk.f32.vlgmr.msra.gmra.mrb[0].mxu1 %vm4814_vm1, %v4802_v1 }
 0x4ac   : > { %v4884_v3 = vpop.f32.mrb[0].mxu1 }
 0x4ad   : > { %v4885_v4 = vadd.f32 %v5369_v2, %v4884_v3  ;;  %v5971_v5 = vpop.f32.mrb[1].mxu1 }
 0x4af   : > { %v5371_v6 = vmul.f32 -1.442695, %v4885_v4 }
 0x4b1   : > { %6479 = vpow2.f32 %v5371_v6 }
 0x4bb   : > { %v6480_v7 = vpop.eup %6479 }
 0x4bc   : > { %v4891_v8 = vadd.f32 1.0, %v6480_v7 }
 0x4be   : > { %6481 = vrcp.f32 %v4891_v8 }
 0x4c8   : > { %v6482_v9 = vpop.eup %6481 }
 0x4c9   : > { %v4894_v10 = vmul.f32 2.0, %v6482_v9 }
 0x4cb   : > { %4896 = vst.msk [vmem:[%s7418_s7] sm:$0x3] %vm4895_vm2, %v4894_v10 }
 0x4cc PF: > { %s7445_s29 = sld [smem:[#allocation15_spill]]  ;;  %s7446_s20 = sld [smem:[#allocation16_spill]] }
 0x4cd   : > { %s7447_s26 = smov %s6635_s27  ;;  %s7448_s27 = smov %s6639_s28 }
 0x4d2   : > { %p21_p2 = scmp.ge.s32.totalorder %s7445_s29, 4   ;;  %s7449_s28 = smov %s7446_s20 }
 0x4d4   :  { %23 = sbr.rel (!%p21_p2) target bundleno = 8 (0x8), region = 106 }
 0x4db   :  { %4908 = vsyncpa [#allocation5], 1 }
 0x4dc   :  { %4910 = vsyncpa [#allocation5 + $0x1], 1 }
 0x4dd   :  { %4911 = vsyncpa [#allocation7], 1 }
 0x4de   :  { %4913 = vsyncpa [#allocation7 + $0x1], 1 }
 0x4df   :  { %4914 = vsyncpa [#allocation10], 1 }

</bundles_post_ra>
